<compile_context>
chip_gen: v5e
topology: v5e:2x2
jax: 0.10.0
libtpu: 0.0.40
codegen_flags: <defaults>
</compile_context>

<pallas_src>
import math
from functools import partial

import jax
import jax.numpy as jnp
from jax import lax
from jax.experimental import pallas as pl
from jax.experimental.pallas import tpu as pltpu

LN_EPS = 1e-5   # torch nn.LayerNorm default
_LANE = 128


def _gelu_exact(x):
    # torch nn.GELU() default = exact erf formulation (keeps parity with torch).
    return 0.5 * x * (1.0 + lax.erf(x * (1.0 / math.sqrt(2.0))))


def _layernorm(x, gamma, beta):
    mu = jnp.mean(x, axis=-1, keepdims=True)
    var = jnp.mean(jnp.square(x - mu), axis=-1, keepdims=True)
    return (x - mu) * lax.rsqrt(var + LN_EPS) * gamma + beta


def fip_kernel(x_ref, aw_ref,
               w10m_ref, w10s_ref, b10_ref, w11_ref, b11_ref, g1_ref, be1_ref,
               w20_ref, b20_ref, w21_ref, b21_ref, g2_ref, be2_ref,
               o_ref, *, L, D, k, l_chunk):
    TB, N, Lp, Dp = x_ref.shape
    n_chunks = Lp // l_chunk

    def chunk_reduce(body):
        init = jnp.zeros((TB, N, Dp), jnp.float32)
        if n_chunks == 1:
            return body(0, init)
        return lax.fori_loop(0, n_chunks, body, init)

    def fold(t):
        # [TB, N, Dp] -> [TB, N, D]: sum the k lane-packed token segments.
        if k == 1:
            return t
        acc = t[..., 0:D]
        for j in range(1, k):
            acc = acc + t[..., j * D:(j + 1) * D]
        return acc

    # ---- pass 1: token sums, chunked over tokens (no full-tile temporaries) ----
    def sum_body(i, acc):
        off = pl.multiple_of(i * l_chunk, l_chunk)
        xc = x_ref[:, :, pl.ds(off, l_chunk), :].astype(jnp.float32)
        return acc + jnp.sum(xc, axis=2)

    mean = fold(chunk_reduce(sum_body)) * (1.0 / L)            # [TB, N, D]

    # ---- pass 2: centered sum-of-squares (torch-parity two-pass std) ----------
    mean_p = mean if k == 1 else jnp.concatenate([mean] * k, axis=-1)   # [TB,N,Dp]
    mean_b = mean_p[:, :, None, :]

    def sq_body(i, acc):
        off = pl.multiple_of(i * l_chunk, l_chunk)
        xc = x_ref[:, :, pl.ds(off, l_chunk), :].astype(jnp.float32)
        d = xc - mean_b
        return acc + jnp.sum(d * d, axis=2)

    ss = fold(chunk_reduce(sq_body))                           # [TB, N, D]
    # torch .std() is unbiased (ddof=1); for L == 1 torch yields nan -> keep parity.
    inv_lm1 = (1.0 / (L - 1)) if L > 1 else float("nan")
    std = jnp.sqrt(jnp.maximum(ss, 0.0) * inv_lm1)

    # ---- proj1: first Linear split into mean/std halves (no concat copy) -------
    m2 = mean.reshape(TB * N, D)
    s2 = std.reshape(TB * N, D)
    h = (jnp.dot(m2, w10m_ref[...], preferred_element_type=jnp.float32)
         + jnp.dot(s2, w10s_ref[...], preferred_element_type=jnp.float32)
         + b10_ref[...])
    h = _gelu_exact(h)
    h = _gelu_exact(
        jnp.dot(h, w11_ref[...], preferred_element_type=jnp.float32) + b11_ref[...])
    h = _layernorm(h, g1_ref[...], be1_ref[...])               # [TB*N, D]
    h = h.reshape(TB, N, D)

    # ---- softmax(alpha, dim=1) weights were precomputed outside the kernel -----
    h = jnp.sum(aw_ref[...] * h, axis=1)                       # [TB, D]

    # ---- proj2 ------------------------------------------------------------------
    h = _gelu_exact(
        jnp.dot(h, w20_ref[...], preferred_element_type=jnp.float32) + b20_ref[...])
    h = _gelu_exact(
        jnp.dot(h, w21_ref[...], preferred_element_type=jnp.float32) + b21_ref[...])
    h = _layernorm(h, g2_ref[...], be2_ref[...])               # [TB, D]

    o_ref[:, 0, :] = h.astype(o_ref.dtype)


# ------------------------------ tiling heuristics ------------------------------

def _vmem_capacity_bytes():
    try:
        cap = getattr(pltpu.get_tpu_info(), "vmem_capacity_bytes", None)
        if cap:
            return int(cap)
    except Exception:
        pass
    return 128 << 20   # v5e / v6e default assumption


def _largest_divisor_at_most(n, cap):
    best = 1
    for d in range(1, n + 1):
        if n % d == 0 and d <= cap:
            best = d
    return best


def _choose_block_b(B, N, Lp, Dp, x_itemsize):
    """Largest batch-tile that (a) keeps the double-buffered x tile within a
    generation-aware VMEM budget and (b) leaves >= 2 grid steps for v7x's 2 TCs."""
    cap = _vmem_capacity_bytes()
    # 128 MiB parts (v5e/v6e): spend most of VMEM on the x stream.
    # 64 MiB v7x: stay conservative so Mosaic keeps scratch/bookkeeping headroom.
    budget = (72 << 20) if cap >= (96 << 20) else (20 << 20)
    pdp = pl.cdiv(Dp, _LANE) * _LANE
    x_bytes_per_b = N * max(Lp, 8) * pdp * x_itemsize
    max_tb = max(1, budget // max(1, 2 * x_bytes_per_b))
    if B >= 2:
        # Keep >= 2 grid steps so the ("parallel",) axis can shard across both
        # TensorCores on v7x (the extra step is negligible on single-TC parts).
        max_tb = min(max_tb, B // 2)
    return _largest_divisor_at_most(B, max_tb)


def _vmem_limit_bytes(TB, N, Lp, Dp, D, x_itemsize, l_chunk):
    cap = _vmem_capacity_bytes()
    pdp = pl.cdiv(Dp, _LANE) * _LANE
    pd = pl.cdiv(D, _LANE) * _LANE
    x_tile = TB * N * max(Lp, 8) * pdp * x_itemsize            # padded x block
    weights = (5 * pd * pd + (8 + N) * pd) * 4                 # single-buffered consts
    temps = (8 * TB * N * pdp                                   # stats / activations
             + 2 * TB * N * max(l_chunk, 8) * pdp
             + 8 * max(TB, 8) * pd) * 4
    est = 2 * x_tile + weights + temps + (8 << 20)             # 2x: double-buffered x
    hi = (104 << 20) if cap >= (96 << 20) else (52 << 20)      # headroom on v7x
    return int(min(max(est, 32 << 20), hi))


# ---------------------------------- wrapper -------------------------------------

def feature_importance_projector(x, params, *, block_b=None):
    """x: [B, N, L, D] (f32 or bf16) -> [B, D] float32 (eval mode: Dropout = identity)."""
    B, N, L, D = x.shape

    # Lane-pack (L, D) -> (L/k, k*D) when proj_dim < 128: a free contiguous reshape
    # that makes the x block lane-dense (no 128/D DMA + VMEM inflation).
    k = 1
    if D < _LANE and _LANE % D == 0 and L % (_LANE // D) == 0:
        k = _LANE // D
    Lp, Dp = L // k, D * k
    xp = x.reshape(B, N, Lp, Dp)

    TB = _choose_block_b(B, N, Lp, Dp, x.dtype.itemsize) if block_b is None else block_b
    assert B % TB == 0, "block_b must divide the batch size"

    l_chunk = _largest_divisor_at_most(Lp, 16)   # small token chunks for the stats

    # Param-only precompute, hoisted out of the kernel / grid loop (cheap XLA ops).
    aw = jax.nn.softmax(params["alpha"].astype(jnp.float32), axis=1)   # [1, N, D]
    w10 = params["w1_0"]
    w10m, w10s = w10[:D, :], w10[D:, :]

    kernel = partial(fip_kernel, L=L, D=D, k=k, l_chunk=l_chunk)

    def const_spec(shape):
        nd = len(shape)
        # Constant block index across the grid -> single buffer; default
        # double-buffering of resident weights would only burn VMEM.
        return pl.BlockSpec(shape, lambda b, _nd=nd: (0,) * _nd,
                            pipeline_mode=pl.Buffered(1))

    in_specs = [
        pl.BlockSpec((TB, N, Lp, Dp), lambda b: (b, 0, 0, 0)),   # x: batch-tiled
        const_spec((1, N, D)),                                    # softmax(alpha)
        const_spec((D, D)), const_spec((D, D)), const_spec((1, D)),   # proj1 L0
        const_spec((D, D)), const_spec((1, D)),                        # proj1 L1
        const_spec((1, D)), const_spec((1, D)),                        # proj1 LN
        const_spec((D, D)), const_spec((1, D)),                        # proj2 L0
        const_spec((D, D)), const_spec((1, D)),                        # proj2 L1
        const_spec((1, D)), const_spec((1, D)),                        # proj2 LN
    ]
    # 3-D [B, 1, D] output so the (sublane, lane) block dims are full-extent for any
    # batch tile; reshaped to [B, D] in the wrapper.
    out_spec = pl.BlockSpec((TB, 1, D), lambda b: (b, 0, 0))

    out = pl.pallas_call(
        kernel,
        out_shape=jax.ShapeDtypeStruct((B, 1, D), jnp.float32),
        grid=(B // TB,),
        in_specs=in_specs,
        out_specs=out_spec,
        compiler_params=pltpu.CompilerParams(
            dimension_semantics=("parallel",),
            vmem_limit_bytes=_vmem_limit_bytes(TB, N, Lp, Dp, D,
                                               x.dtype.itemsize, l_chunk)),
    )(xp, aw,
      w10m, w10s, params["b1_0"], params["w1_1"], params["b1_1"],
      params["ln1_g"], params["ln1_b"],
      params["w2_0"], params["b2_0"], params["w2_1"], params["b2_1"],
      params["ln2_g"], params["ln2_b"])
    return out.reshape(B, D)


# ------------------------------- params / reference -----------------------------

def init_params(key, intermediate_features_num, proj_dim):
    """Deterministic synthetic parameters (proj_layers = 2)."""
    ks = jax.random.split(key, 5)

    def linear(k, fan_in, fan_out):
        kw, kb = jax.random.split(k)
        bound = 1.0 / math.sqrt(fan_in)
        w = jax.random.uniform(kw, (fan_in, fan_out), jnp.float32, -bound, bound)
        b = jax.random.uniform(kb, (1, fan_out), jnp.float32, -bound, bound)
        return w, b

    alpha = jax.random.normal(ks[0], (1, intermediate_features_num, proj_dim),
                              jnp.float32)
    w1_0, b1_0 = linear(ks[1], 2 * proj_dim, proj_dim)   # proj1 layer 0
    w1_1, b1_1 = linear(ks[2], proj_dim, proj_dim)       # proj1 layer 1
    w2_0, b2_0 = linear(ks[3], proj_dim, proj_dim)       # proj2 layer 0
    w2_1, b2_1 = linear(ks[4], proj_dim, proj_dim)       # proj2 layer 1

    return dict(
        alpha=alpha,
        w1_0=w1_0, b1_0=b1_0, w1_1=w1_1, b1_1=b1_1,
        ln1_g=jnp.ones((1, proj_dim), jnp.float32),
        ln1_b=jnp.zeros((1, proj_dim), jnp.float32),
        w2_0=w2_0, b2_0=b2_0, w2_1=w2_1, b2_1=b2_1,
        ln2_g=jnp.ones((1, proj_dim), jnp.float32),
        ln2_b=jnp.zeros((1, proj_dim), jnp.float32),
    )


def _reference(x, params):
    """Pure-JAX reference of the torch forward (eval mode), f32 / highest precision."""
    dot = partial(jnp.matmul, precision=lax.Precision.HIGHEST)
    g = lambda t: 0.5 * t * (1.0 + lax.erf(t * (1.0 / math.sqrt(2.0))))
    ln = lambda t, ga, be: (t - t.mean(-1, keepdims=True)) * lax.rsqrt(
        t.var(-1, keepdims=True) + LN_EPS) * ga + be
    mean = jnp.mean(x, axis=2)
    std = jnp.std(x, axis=2, ddof=1)
    h = jnp.concatenate([mean, std], axis=-1)
    h = g(dot(h, params["w1_0"]) + params["b1_0"])
    h = g(dot(h, params["w1_1"]) + params["b1_1"])
    h = ln(h, params["ln1_g"], params["ln1_b"])
    a = jax.nn.softmax(params["alpha"], axis=1)
    h = jnp.sum(a * h, axis=1)
    h = g(dot(h, params["w2_0"]) + params["b2_0"])
    h = g(dot(h, params["w2_1"]) + params["b2_1"])
    h = ln(h, params["ln2_g"], params["ln2_b"])
    return h


if __name__ == "__main__":
    # Small shapes consistent with the module:
    # batch=2, intermediate_features_num=4, tokens=8, proj_dim=32, proj_layers=2
    B, N, L, D = 2, 4, 8, 32

    key = jax.random.PRNGKey(0)
    kx, kp = jax.random.split(key)
    x = jax.random.normal(kx, (B, N, L, D), jnp.float32)
    params = init_params(kp, N, D)

    # Stream x in bf16 (HBM-bandwidth lever); the kernel upcasts per chunk and
    # accumulates all statistics / matmuls in f32.
    x_bf16 = x.astype(jnp.bfloat16)

    out = feature_importance_projector(x_bf16, params)
    out = jax.block_until_ready(out)
    assert out.shape == (B, D) and out.dtype == jnp.float32
    assert bool(jnp.all(jnp.isfinite(out)))

    # Reference sees the exact same (bf16-quantized) inputs, computed in f32.
    ref = _reference(x_bf16.astype(jnp.float32), params)
    assert bool(jnp.allclose(out, ref, rtol=1e-2, atol=1e-3)), "mismatch vs reference"
    print("KERNEL_OK")
</pallas_src>

<mosaic_0001>
module attributes {stable_mosaic.version = 11 : i64} {
  func.func @fip_kernel(%arg0: i32, %arg1: memref<1x4x2x128xbf16, #tpu.memory_space<vmem>>, %arg2: memref<1x4x32xf32, #tpu.memory_space<vmem>>, %arg3: memref<32x32xf32, #tpu.memory_space<vmem>>, %arg4: memref<32x32xf32, #tpu.memory_space<vmem>>, %arg5: memref<1x32xf32, #tpu.memory_space<vmem>>, %arg6: memref<32x32xf32, #tpu.memory_space<vmem>>, %arg7: memref<1x32xf32, #tpu.memory_space<vmem>>, %arg8: memref<1x32xf32, #tpu.memory_space<vmem>>, %arg9: memref<1x32xf32, #tpu.memory_space<vmem>>, %arg10: memref<32x32xf32, #tpu.memory_space<vmem>>, %arg11: memref<1x32xf32, #tpu.memory_space<vmem>>, %arg12: memref<32x32xf32, #tpu.memory_space<vmem>>, %arg13: memref<1x32xf32, #tpu.memory_space<vmem>>, %arg14: memref<1x32xf32, #tpu.memory_space<vmem>>, %arg15: memref<1x32xf32, #tpu.memory_space<vmem>>, %arg16: memref<1x1x32xf32, #tpu.memory_space<vmem>>) attributes {dimension_semantics = [#tpu.dimension_semantics<parallel>], iteration_bounds = array<i64: 2>, scalar_prefetch = 0 : i64, scratch_operands = 0 : i64, tpu.core_type = #tpu.core_type<tc>, window_params = [{transform_indices = @transform_0, window_bounds = array<i64: 1, 4, 2, 128>}, {pipeline_mode = #tpu.pipeline_mode<synchronous>, transform_indices = @transform_1, window_bounds = array<i64: 1, 4, 32>}, {pipeline_mode = #tpu.pipeline_mode<synchronous>, transform_indices = @transform_2, window_bounds = array<i64: 32, 32>}, {pipeline_mode = #tpu.pipeline_mode<synchronous>, transform_indices = @transform_3, window_bounds = array<i64: 32, 32>}, {pipeline_mode = #tpu.pipeline_mode<synchronous>, transform_indices = @transform_4, window_bounds = array<i64: 1, 32>}, {pipeline_mode = #tpu.pipeline_mode<synchronous>, transform_indices = @transform_5, window_bounds = array<i64: 32, 32>}, {pipeline_mode = #tpu.pipeline_mode<synchronous>, transform_indices = @transform_6, window_bounds = array<i64: 1, 32>}, {pipeline_mode = #tpu.pipeline_mode<synchronous>, transform_indices = @transform_7, window_bounds = array<i64: 1, 32>}, {pipeline_mode = #tpu.pipeline_mode<synchronous>, transform_indices = @transform_8, window_bounds = array<i64: 1, 32>}, {pipeline_mode = #tpu.pipeline_mode<synchronous>, transform_indices = @transform_9, window_bounds = array<i64: 32, 32>}, {pipeline_mode = #tpu.pipeline_mode<synchronous>, transform_indices = @transform_10, window_bounds = array<i64: 1, 32>}, {pipeline_mode = #tpu.pipeline_mode<synchronous>, transform_indices = @transform_11, window_bounds = array<i64: 32, 32>}, {pipeline_mode = #tpu.pipeline_mode<synchronous>, transform_indices = @transform_12, window_bounds = array<i64: 1, 32>}, {pipeline_mode = #tpu.pipeline_mode<synchronous>, transform_indices = @transform_13, window_bounds = array<i64: 1, 32>}, {pipeline_mode = #tpu.pipeline_mode<synchronous>, transform_indices = @transform_14, window_bounds = array<i64: 1, 32>}, {transform_indices = @transform_15, window_bounds = array<i64: 1, 1, 32>}]} {
    %cst = arith.constant 0.000000e+00 : f32
    %0 = vector.broadcast %cst : f32 to vector<1x4x128xf32>
    %c0_i32 = arith.constant 0 : i32
    %1 = tpu.assume_multiple %c0_i32, 2 : i32
    %c0 = arith.constant 0 : index
    %c0_0 = arith.constant 0 : index
    %2 = arith.index_cast %1 : i32 to index
    %c0_1 = arith.constant 0 : index
    %3 = vector.load %arg1[%c0, %c0_0, %2, %c0_1] : memref<1x4x2x128xbf16, #tpu.memory_space<vmem>>, vector<1x4x2x128xbf16>
    %4 = arith.extf %3 : vector<1x4x2x128xbf16> to vector<1x4x2x128xf32>
    %cst_2 = arith.constant dense<0.000000e+00> : vector<1x4x128xf32>
    %5 = vector.multi_reduction <add>, %4, %cst_2 [2] : vector<1x4x2x128xf32> to vector<1x4x128xf32>
    %6 = arith.addf %0, %5 : vector<1x4x128xf32>
    %7 = vector.extract_strided_slice %6 {offsets = [0, 0, 0], sizes = [1, 4, 32], strides = [1, 1, 1]} : vector<1x4x128xf32> to vector<1x4x32xf32>
    %8 = vector.extract_strided_slice %6 {offsets = [0, 0, 32], sizes = [1, 4, 32], strides = [1, 1, 1]} : vector<1x4x128xf32> to vector<1x4x32xf32>
    %9 = arith.addf %7, %8 : vector<1x4x32xf32>
    %10 = vector.extract_strided_slice %6 {offsets = [0, 0, 64], sizes = [1, 4, 32], strides = [1, 1, 1]} : vector<1x4x128xf32> to vector<1x4x32xf32>
    %11 = arith.addf %9, %10 : vector<1x4x32xf32>
    %12 = vector.extract_strided_slice %6 {offsets = [0, 0, 96], sizes = [1, 4, 32], strides = [1, 1, 1]} : vector<1x4x128xf32> to vector<1x4x32xf32>
    %13 = arith.addf %11, %12 : vector<1x4x32xf32>
    %cst_3 = arith.constant 1.250000e-01 : f32
    %14 = vector.broadcast %cst_3 : f32 to vector<1x4x32xf32>
    %15 = arith.mulf %13, %14 : vector<1x4x32xf32>
    %16 = tpu.concatenate %15, %15, %15, %15 in 2 : vector<1x4x32xf32>, vector<1x4x32xf32>, vector<1x4x32xf32>, vector<1x4x32xf32> -> vector<1x4x128xf32>
    %17 = vector.shape_cast %16 : vector<1x4x128xf32> to vector<1x4x1x128xf32>
    %cst_4 = arith.constant 0.000000e+00 : f32
    %18 = vector.broadcast %cst_4 : f32 to vector<1x4x128xf32>
    %c0_i32_5 = arith.constant 0 : i32
    %19 = tpu.assume_multiple %c0_i32_5, 2 : i32
    %c0_6 = arith.constant 0 : index
    %c0_7 = arith.constant 0 : index
    %20 = arith.index_cast %19 : i32 to index
    %c0_8 = arith.constant 0 : index
    %21 = vector.load %arg1[%c0_6, %c0_7, %20, %c0_8] : memref<1x4x2x128xbf16, #tpu.memory_space<vmem>>, vector<1x4x2x128xbf16>
    %22 = arith.extf %21 : vector<1x4x2x128xbf16> to vector<1x4x2x128xf32>
    %23 = vector.broadcast %17 : vector<1x4x1x128xf32> to vector<1x4x2x128xf32>
    %24 = arith.subf %22, %23 : vector<1x4x2x128xf32>
    %25 = arith.mulf %24, %24 : vector<1x4x2x128xf32>
    %cst_9 = arith.constant dense<0.000000e+00> : vector<1x4x128xf32>
    %26 = vector.multi_reduction <add>, %25, %cst_9 [2] : vector<1x4x2x128xf32> to vector<1x4x128xf32>
    %27 = arith.addf %18, %26 : vector<1x4x128xf32>
    %28 = vector.extract_strided_slice %27 {offsets = [0, 0, 0], sizes = [1, 4, 32], strides = [1, 1, 1]} : vector<1x4x128xf32> to vector<1x4x32xf32>
    %29 = vector.extract_strided_slice %27 {offsets = [0, 0, 32], sizes = [1, 4, 32], strides = [1, 1, 1]} : vector<1x4x128xf32> to vector<1x4x32xf32>
    %30 = arith.addf %28, %29 : vector<1x4x32xf32>
    %31 = vector.extract_strided_slice %27 {offsets = [0, 0, 64], sizes = [1, 4, 32], strides = [1, 1, 1]} : vector<1x4x128xf32> to vector<1x4x32xf32>
    %32 = arith.addf %30, %31 : vector<1x4x32xf32>
    %33 = vector.extract_strided_slice %27 {offsets = [0, 0, 96], sizes = [1, 4, 32], strides = [1, 1, 1]} : vector<1x4x128xf32> to vector<1x4x32xf32>
    %34 = arith.addf %32, %33 : vector<1x4x32xf32>
    %cst_10 = arith.constant 0.000000e+00 : f32
    %35 = vector.broadcast %cst_10 : f32 to vector<1x4x32xf32>
    %36 = arith.maximumf %34, %35 : vector<1x4x32xf32>
    %cst_11 = arith.constant 0.142857149 : f32
    %37 = vector.broadcast %cst_11 : f32 to vector<1x4x32xf32>
    %38 = arith.mulf %36, %37 : vector<1x4x32xf32>
    %39 = math.sqrt %38 : vector<1x4x32xf32>
    %40 = vector.shape_cast %15 : vector<1x4x32xf32> to vector<4x32xf32>
    %41 = vector.shape_cast %39 : vector<1x4x32xf32> to vector<4x32xf32>
    %c0_12 = arith.constant 0 : index
    %c0_13 = arith.constant 0 : index
    %42 = vector.load %arg3[%c0_12, %c0_13] : memref<32x32xf32, #tpu.memory_space<vmem>>, vector<32x32xf32>
    %cst_14 = arith.constant dense<0.000000e+00> : vector<4x32xf32>
    %43 = tpu.matmul %40, %42, %cst_14 {dimension_numbers = #tpu.dot_dimension_numbers<[1], [0], [0], [1], [0, 0, 1, 1], [], []>} : vector<4x32xf32>, vector<32x32xf32>, vector<4x32xf32> -> vector<4x32xf32>
    %c0_15 = arith.constant 0 : index
    %c0_16 = arith.constant 0 : index
    %44 = vector.load %arg4[%c0_15, %c0_16] : memref<32x32xf32, #tpu.memory_space<vmem>>, vector<32x32xf32>
    %cst_17 = arith.constant dense<0.000000e+00> : vector<4x32xf32>
    %45 = tpu.matmul %41, %44, %cst_17 {dimension_numbers = #tpu.dot_dimension_numbers<[1], [0], [0], [1], [0, 0, 1, 1], [], []>} : vector<4x32xf32>, vector<32x32xf32>, vector<4x32xf32> -> vector<4x32xf32>
    %46 = arith.addf %43, %45 : vector<4x32xf32>
    %c0_18 = arith.constant 0 : index
    %c0_19 = arith.constant 0 : index
    %47 = vector.load %arg5[%c0_18, %c0_19] : memref<1x32xf32, #tpu.memory_space<vmem>>, vector<1x32xf32>
    %48 = vector.broadcast %47 : vector<1x32xf32> to vector<4x32xf32>
    %49 = arith.addf %46, %48 : vector<4x32xf32>
    %cst_20 = arith.constant 5.000000e-01 : f32
    %50 = vector.broadcast %cst_20 : f32 to vector<4x32xf32>
    %51 = arith.mulf %50, %49 : vector<4x32xf32>
    %cst_21 = arith.constant 0.707106769 : f32
    %52 = vector.broadcast %cst_21 : f32 to vector<4x32xf32>
    %53 = arith.mulf %49, %52 : vector<4x32xf32>
    %54 = math.erf %53 : vector<4x32xf32>
    %cst_22 = arith.constant 1.000000e+00 : f32
    %55 = vector.broadcast %cst_22 : f32 to vector<4x32xf32>
    %56 = arith.addf %55, %54 : vector<4x32xf32>
    %57 = arith.mulf %51, %56 : vector<4x32xf32>
    %c0_23 = arith.constant 0 : index
    %c0_24 = arith.constant 0 : index
    %58 = vector.load %arg6[%c0_23, %c0_24] : memref<32x32xf32, #tpu.memory_space<vmem>>, vector<32x32xf32>
    %cst_25 = arith.constant dense<0.000000e+00> : vector<4x32xf32>
    %59 = tpu.matmul %57, %58, %cst_25 {dimension_numbers = #tpu.dot_dimension_numbers<[1], [0], [0], [1], [0, 0, 1, 1], [], []>} : vector<4x32xf32>, vector<32x32xf32>, vector<4x32xf32> -> vector<4x32xf32>
    %c0_26 = arith.constant 0 : index
    %c0_27 = arith.constant 0 : index
    %60 = vector.load %arg7[%c0_26, %c0_27] : memref<1x32xf32, #tpu.memory_space<vmem>>, vector<1x32xf32>
    %61 = vector.broadcast %60 : vector<1x32xf32> to vector<4x32xf32>
    %62 = arith.addf %59, %61 : vector<4x32xf32>
    %cst_28 = arith.constant 5.000000e-01 : f32
    %63 = vector.broadcast %cst_28 : f32 to vector<4x32xf32>
    %64 = arith.mulf %63, %62 : vector<4x32xf32>
    %cst_29 = arith.constant 0.707106769 : f32
    %65 = vector.broadcast %cst_29 : f32 to vector<4x32xf32>
    %66 = arith.mulf %62, %65 : vector<4x32xf32>
    %67 = math.erf %66 : vector<4x32xf32>
    %cst_30 = arith.constant 1.000000e+00 : f32
    %68 = vector.broadcast %cst_30 : f32 to vector<4x32xf32>
    %69 = arith.addf %68, %67 : vector<4x32xf32>
    %70 = arith.mulf %64, %69 : vector<4x32xf32>
    %c0_31 = arith.constant 0 : index
    %c0_32 = arith.constant 0 : index
    %71 = vector.load %arg8[%c0_31, %c0_32] : memref<1x32xf32, #tpu.memory_space<vmem>>, vector<1x32xf32>
    %c0_33 = arith.constant 0 : index
    %c0_34 = arith.constant 0 : index
    %72 = vector.load %arg9[%c0_33, %c0_34] : memref<1x32xf32, #tpu.memory_space<vmem>>, vector<1x32xf32>
    %cst_35 = arith.constant dense<0.000000e+00> : vector<4xf32>
    %73 = vector.multi_reduction <add>, %70, %cst_35 [1] : vector<4x32xf32> to vector<4xf32>
    %74 = vector.shape_cast %73 : vector<4xf32> to vector<4x1xf32>
    %cst_36 = arith.constant 3.200000e+01 : f32
    %75 = vector.broadcast %cst_36 : f32 to vector<4x1xf32>
    %76 = arith.divf %74, %75 : vector<4x1xf32>
    %77 = vector.broadcast %76 : vector<4x1xf32> to vector<4x32xf32>
    %78 = arith.subf %70, %77 : vector<4x32xf32>
    %79 = arith.mulf %78, %78 : vector<4x32xf32>
    %cst_37 = arith.constant dense<0.000000e+00> : vector<4xf32>
    %80 = vector.multi_reduction <add>, %79, %cst_37 [1] : vector<4x32xf32> to vector<4xf32>
    %81 = vector.shape_cast %80 : vector<4xf32> to vector<4x1xf32>
    %cst_38 = arith.constant 3.200000e+01 : f32
    %82 = vector.broadcast %cst_38 : f32 to vector<4x1xf32>
    %83 = arith.divf %81, %82 : vector<4x1xf32>
    %84 = vector.broadcast %76 : vector<4x1xf32> to vector<4x32xf32>
    %85 = arith.subf %70, %84 : vector<4x32xf32>
    %cst_39 = arith.constant 9.99999974E-6 : f32
    %86 = vector.broadcast %cst_39 : f32 to vector<4x1xf32>
    %87 = arith.addf %83, %86 : vector<4x1xf32>
    %88 = math.rsqrt %87 : vector<4x1xf32>
    %89 = vector.broadcast %88 : vector<4x1xf32> to vector<4x32xf32>
    %90 = arith.mulf %85, %89 : vector<4x32xf32>
    %91 = vector.broadcast %71 : vector<1x32xf32> to vector<4x32xf32>
    %92 = arith.mulf %90, %91 : vector<4x32xf32>
    %93 = vector.broadcast %72 : vector<1x32xf32> to vector<4x32xf32>
    %94 = arith.addf %92, %93 : vector<4x32xf32>
    %95 = vector.shape_cast %94 : vector<4x32xf32> to vector<1x4x32xf32>
    %c0_40 = arith.constant 0 : index
    %c0_41 = arith.constant 0 : index
    %c0_42 = arith.constant 0 : index
    %96 = vector.load %arg2[%c0_40, %c0_41, %c0_42] : memref<1x4x32xf32, #tpu.memory_space<vmem>>, vector<1x4x32xf32>
    %97 = arith.mulf %96, %95 : vector<1x4x32xf32>
    %cst_43 = arith.constant dense<0.000000e+00> : vector<1x32xf32>
    %98 = vector.multi_reduction <add>, %97, %cst_43 [1] : vector<1x4x32xf32> to vector<1x32xf32>
    %c0_44 = arith.constant 0 : index
    %c0_45 = arith.constant 0 : index
    %99 = vector.load %arg10[%c0_44, %c0_45] : memref<32x32xf32, #tpu.memory_space<vmem>>, vector<32x32xf32>
    %cst_46 = arith.constant dense<0.000000e+00> : vector<1x32xf32>
    %100 = tpu.matmul %98, %99, %cst_46 {dimension_numbers = #tpu.dot_dimension_numbers<[1], [0], [0], [1], [0, 0, 1, 1], [], []>} : vector<1x32xf32>, vector<32x32xf32>, vector<1x32xf32> -> vector<1x32xf32>
    %c0_47 = arith.constant 0 : index
    %c0_48 = arith.constant 0 : index
    %101 = vector.load %arg11[%c0_47, %c0_48] : memref<1x32xf32, #tpu.memory_space<vmem>>, vector<1x32xf32>
    %102 = arith.addf %100, %101 : vector<1x32xf32>
    %cst_49 = arith.constant 5.000000e-01 : f32
    %103 = vector.broadcast %cst_49 : f32 to vector<1x32xf32>
    %104 = arith.mulf %103, %102 : vector<1x32xf32>
    %cst_50 = arith.constant 0.707106769 : f32
    %105 = vector.broadcast %cst_50 : f32 to vector<1x32xf32>
    %106 = arith.mulf %102, %105 : vector<1x32xf32>
    %107 = math.erf %106 : vector<1x32xf32>
    %cst_51 = arith.constant 1.000000e+00 : f32
    %108 = vector.broadcast %cst_51 : f32 to vector<1x32xf32>
    %109 = arith.addf %108, %107 : vector<1x32xf32>
    %110 = arith.mulf %104, %109 : vector<1x32xf32>
    %c0_52 = arith.constant 0 : index
    %c0_53 = arith.constant 0 : index
    %111 = vector.load %arg12[%c0_52, %c0_53] : memref<32x32xf32, #tpu.memory_space<vmem>>, vector<32x32xf32>
    %cst_54 = arith.constant dense<0.000000e+00> : vector<1x32xf32>
    %112 = tpu.matmul %110, %111, %cst_54 {dimension_numbers = #tpu.dot_dimension_numbers<[1], [0], [0], [1], [0, 0, 1, 1], [], []>} : vector<1x32xf32>, vector<32x32xf32>, vector<1x32xf32> -> vector<1x32xf32>
    %c0_55 = arith.constant 0 : index
    %c0_56 = arith.constant 0 : index
    %113 = vector.load %arg13[%c0_55, %c0_56] : memref<1x32xf32, #tpu.memory_space<vmem>>, vector<1x32xf32>
    %114 = arith.addf %112, %113 : vector<1x32xf32>
    %cst_57 = arith.constant 5.000000e-01 : f32
    %115 = vector.broadcast %cst_57 : f32 to vector<1x32xf32>
    %116 = arith.mulf %115, %114 : vector<1x32xf32>
    %cst_58 = arith.constant 0.707106769 : f32
    %117 = vector.broadcast %cst_58 : f32 to vector<1x32xf32>
    %118 = arith.mulf %114, %117 : vector<1x32xf32>
    %119 = math.erf %118 : vector<1x32xf32>
    %cst_59 = arith.constant 1.000000e+00 : f32
    %120 = vector.broadcast %cst_59 : f32 to vector<1x32xf32>
    %121 = arith.addf %120, %119 : vector<1x32xf32>
    %122 = arith.mulf %116, %121 : vector<1x32xf32>
    %c0_60 = arith.constant 0 : index
    %c0_61 = arith.constant 0 : index
    %123 = vector.load %arg14[%c0_60, %c0_61] : memref<1x32xf32, #tpu.memory_space<vmem>>, vector<1x32xf32>
    %c0_62 = arith.constant 0 : index
    %c0_63 = arith.constant 0 : index
    %124 = vector.load %arg15[%c0_62, %c0_63] : memref<1x32xf32, #tpu.memory_space<vmem>>, vector<1x32xf32>
    %cst_64 = arith.constant dense<0.000000e+00> : vector<1xf32>
    %125 = vector.multi_reduction <add>, %122, %cst_64 [1] : vector<1x32xf32> to vector<1xf32>
    %126 = vector.shape_cast %125 : vector<1xf32> to vector<1x1xf32>
    %cst_65 = arith.constant 3.200000e+01 : f32
    %127 = vector.broadcast %cst_65 : f32 to vector<1x1xf32>
    %128 = arith.divf %126, %127 : vector<1x1xf32>
    %129 = vector.broadcast %128 : vector<1x1xf32> to vector<1x32xf32>
    %130 = arith.subf %122, %129 : vector<1x32xf32>
    %131 = arith.mulf %130, %130 : vector<1x32xf32>
    %cst_66 = arith.constant dense<0.000000e+00> : vector<1xf32>
    %132 = vector.multi_reduction <add>, %131, %cst_66 [1] : vector<1x32xf32> to vector<1xf32>
    %133 = vector.shape_cast %132 : vector<1xf32> to vector<1x1xf32>
    %cst_67 = arith.constant 3.200000e+01 : f32
    %134 = vector.broadcast %cst_67 : f32 to vector<1x1xf32>
    %135 = arith.divf %133, %134 : vector<1x1xf32>
    %136 = vector.broadcast %128 : vector<1x1xf32> to vector<1x32xf32>
    %137 = arith.subf %122, %136 : vector<1x32xf32>
    %cst_68 = arith.constant 9.99999974E-6 : f32
    %138 = vector.broadcast %cst_68 : f32 to vector<1x1xf32>
    %139 = arith.addf %135, %138 : vector<1x1xf32>
    %140 = math.rsqrt %139 : vector<1x1xf32>
    %141 = vector.broadcast %140 : vector<1x1xf32> to vector<1x32xf32>
    %142 = arith.mulf %137, %141 : vector<1x32xf32>
    %143 = arith.mulf %142, %123 : vector<1x32xf32>
    %144 = arith.addf %143, %124 : vector<1x32xf32>
    %c0_69 = arith.constant 0 : index
    %c0_70 = arith.constant 0 : index
    %c0_71 = arith.constant 0 : index
    %145 = vector.load %arg16[%c0_69, %c0_70, %c0_71] : memref<1x1x32xf32, #tpu.memory_space<vmem>>, vector<1x1x32xf32>
    %146 = vector.shape_cast %145 : vector<1x1x32xf32> to vector<1x32xf32>
    %147 = vector.shape_cast %144 : vector<1x32xf32> to vector<1x1x32xf32>
    tpu.vector_store %arg16[%c0_69, %c0_70, %c0_71], %147 {strides = array<i32>} : memref<1x1x32xf32, #tpu.memory_space<vmem>>, vector<1x1x32xf32>,
    return
  }
  func.func @transform_0(%arg0: i32) -> (i32, i32, i32, i32) {
    %c0_i32 = arith.constant 0 : i32
    %c0_i32_0 = arith.constant 0 : i32
    %c0_i32_1 = arith.constant 0 : i32
    %c0_i32_2 = arith.constant 0 : i32
    return %arg0, %c0_i32, %c0_i32_0, %c0_i32_1 : i32, i32, i32, i32
  }
  func.func @transform_1(%arg0: i32) -> (i32, i32, i32) {
    %c0_i32 = arith.constant 0 : i32
    %c0_i32_0 = arith.constant 0 : i32
    %c0_i32_1 = arith.constant 0 : i32
    %c0_i32_2 = arith.constant 0 : i32
    return %c0_i32, %c0_i32_0, %c0_i32_1 : i32, i32, i32
  }
  func.func @transform_2(%arg0: i32) -> (i32, i32) {
    %c0_i32 = arith.constant 0 : i32
    %c0_i32_0 = arith.constant 0 : i32
    %c0_i32_1 = arith.constant 0 : i32
    return %c0_i32, %c0_i32_0 : i32, i32
  }
  func.func @transform_3(%arg0: i32) -> (i32, i32) {
    %c0_i32 = arith.constant 0 : i32
    %c0_i32_0 = arith.constant 0 : i32
    %c0_i32_1 = arith.constant 0 : i32
    return %c0_i32, %c0_i32_0 : i32, i32
  }
  func.func @transform_4(%arg0: i32) -> (i32, i32) {
    %c0_i32 = arith.constant 0 : i32
    %c0_i32_0 = arith.constant 0 : i32
    %c0_i32_1 = arith.constant 0 : i32
    return %c0_i32, %c0_i32_0 : i32, i32
  }
  func.func @transform_5(%arg0: i32) -> (i32, i32) {
    %c0_i32 = arith.constant 0 : i32
    %c0_i32_0 = arith.constant 0 : i32
    %c0_i32_1 = arith.constant 0 : i32
    return %c0_i32, %c0_i32_0 : i32, i32
  }
  func.func @transform_6(%arg0: i32) -> (i32, i32) {
    %c0_i32 = arith.constant 0 : i32
    %c0_i32_0 = arith.constant 0 : i32
    %c0_i32_1 = arith.constant 0 : i32
    return %c0_i32, %c0_i32_0 : i32, i32
  }
  func.func @transform_7(%arg0: i32) -> (i32, i32) {
    %c0_i32 = arith.constant 0 : i32
    %c0_i32_0 = arith.constant 0 : i32
    %c0_i32_1 = arith.constant 0 : i32
    return %c0_i32, %c0_i32_0 : i32, i32
  }
  func.func @transform_8(%arg0: i32) -> (i32, i32) {
    %c0_i32 = arith.constant 0 : i32
    %c0_i32_0 = arith.constant 0 : i32
    %c0_i32_1 = arith.constant 0 : i32
    return %c0_i32, %c0_i32_0 : i32, i32
  }
  func.func @transform_9(%arg0: i32) -> (i32, i32) {
    %c0_i32 = arith.constant 0 : i32
    %c0_i32_0 = arith.constant 0 : i32
    %c0_i32_1 = arith.constant 0 : i32
    return %c0_i32, %c0_i32_0 : i32, i32
  }
  func.func @transform_10(%arg0: i32) -> (i32, i32) {
    %c0_i32 = arith.constant 0 : i32
    %c0_i32_0 = arith.constant 0 : i32
    %c0_i32_1 = arith.constant 0 : i32
    return %c0_i32, %c0_i32_0 : i32, i32
  }
  func.func @transform_11(%arg0: i32) -> (i32, i32) {
    %c0_i32 = arith.constant 0 : i32
    %c0_i32_0 = arith.constant 0 : i32
    %c0_i32_1 = arith.constant 0 : i32
    return %c0_i32, %c0_i32_0 : i32, i32
  }
  func.func @transform_12(%arg0: i32) -> (i32, i32) {
    %c0_i32 = arith.constant 0 : i32
    %c0_i32_0 = arith.constant 0 : i32
    %c0_i32_1 = arith.constant 0 : i32
    return %c0_i32, %c0_i32_0 : i32, i32
  }
  func.func @transform_13(%arg0: i32) -> (i32, i32) {
    %c0_i32 = arith.constant 0 : i32
    %c0_i32_0 = arith.constant 0 : i32
    %c0_i32_1 = arith.constant 0 : i32
    return %c0_i32, %c0_i32_0 : i32, i32
  }
  func.func @transform_14(%arg0: i32) -> (i32, i32) {
    %c0_i32 = arith.constant 0 : i32
    %c0_i32_0 = arith.constant 0 : i32
    %c0_i32_1 = arith.constant 0 : i32
    return %c0_i32, %c0_i32_0 : i32, i32
  }
  func.func @transform_15(%arg0: i32) -> (i32, i32, i32) {
    %c0_i32 = arith.constant 0 : i32
    %c0_i32_0 = arith.constant 0 : i32
    %c0_i32_1 = arith.constant 0 : i32
    return %arg0, %c0_i32, %c0_i32_0 : i32, i32, i32
  }
}

</mosaic_0001>

<bundles_post_ra>
// kernel: tpu_custom_call.1
= control target key start
LH: loop header
LB: loop body
LE: loop exit
PB: predicated region body
PF: predicated region fallthrough
CT: control target
= control target key end

     0   :  { %s2287_s0 = inlined_call_operand.hbm [shape: bf16[2,4,2,128], index: 0, kind: input, shape index: {}]   ;;  %s2288_s1 = inlined_call_operand.hbm [shape: f32[1,4,32], index: 1, kind: input, shape index: {}]   ;;  %s2289_s2 = inlined_call_operand.hbm [shape: f32[32,32], index: 2, kind: input, shape index: {}]   ;;  %s2290_s3 = inlined_call_operand.hbm [shape: f32[32,32], index: 3, kind: input, shape index: {}]   ;;  %s2291_s4 = inlined_call_operand.vmem [shape: f32[1,32], index: 4, kind: input, shape index: {}]   ;;  %s2292_s5 = inlined_call_operand.hbm [shape: f32[32,32], index: 5, kind: input, shape index: {}]   ;;  %s2293_s6 = inlined_call_operand.vmem [shape: f32[1,32], index: 6, kind: input, shape index: {}]   ;;  %s2294_s7 = inlined_call_operand.vmem [shape: f32[1,32], index: 7, kind: input, shape index: {}]   ;;  %s2295_s8 = inlined_call_operand.vmem [shape: f32[1,32], index: 8, kind: input, shape index: {}]   ;;  %s2296_s9 = inlined_call_operand.hbm [shape: f32[32,32], index: 9, kind: input, shape index: {}]   ;;  %s2297_s10 = inlined_call_operand.vmem [shape: f32[1,32], index: 10, kind: input, shape index: {}]   ;;  %s2298_s11 = inlined_call_operand.hbm [shape: f32[32,32], index: 11, kind: input, shape index: {}]   ;;  %s2299_s12 = inlined_call_operand.vmem [shape: f32[1,32], index: 12, kind: input, shape index: {}]   ;;  %s2300_s13 = inlined_call_operand.vmem [shape: f32[1,32], index: 13, kind: input, shape index: {}]   ;;  %s2301_s14 = inlined_call_operand.vmem [shape: f32[1,32], index: 14, kind: input, shape index: {}]   ;;  %s2302_s15 = inlined_call_operand.hbm [shape: f32[2,1,32], index: 15, kind: output, shape index: {}]  }
   0x1   :  { %2304 = sst [smem:[#allocation20_spill]] %s2288_s1 }
   0x2   :  { %2305 = sst [smem:[#allocation21_spill]] %s2289_s2 }
   0x3   :  { %2306 = sst [smem:[#allocation22_spill]] %s2290_s3 }
   0x4   :  { %2307 = sst [smem:[#allocation23_spill]] %s2292_s5 }
   0x5   :  { %2308 = sst [smem:[#allocation24_spill]] %s2296_s9 }
   0x6   :  { %2309 = sst [smem:[#allocation25_spill]] %s2297_s10 }
   0x7   :  { %2310 = sst [smem:[#allocation26_spill]] %s2299_s12 }
   0x8   :  { %2311 = sst [smem:[#allocation27_spill]] %s2300_s13 }
   0x9   :  { %2312 = sst [smem:[#allocation28_spill]] %s2301_s14 }
   0xa   :  { %2313 = sst [smem:[#allocation29_spill]] %s2302_s15 }
   0xb   :  { %20 = vsyncpa [#allocation3], 0 }
   0xc   :  { %22 = vsyncpa [#allocation3 + $0x1], 0 }
   0xd   :  { %23 = vsyncpa [#allocation6], 0 }
   0xe   :  { %24 = vsyncpa [#allocation9], 0 }
   0xf   :  { %25 = vsyncpa [#allocation12], 0 }
  0x10   :  { %26 = vsyncpa [#allocation4], 0 }
  0x11   :  { %28 = vsyncpa [#allocation4 + $0x1], 0  ;;  %s1994_s18 = smov 0   ;;  %s1996_s19 = smov 0  }
  0x12   :  { %s1998_s20 = smov 0   ;;  %s2000_s21 = smov 0  }
  0x13 LB: > { %s2314_s1 = sld [smem:[#allocation20_spill]]  ;;  %s2018_s25 = sadd.s32 4294967295, %s1898_s21   ;;  %s1898_s21 = sphi %s2000_s21, %s2335_s21   ;;  %s1894_s20 = sphi %s1998_s20, %s2334_s20   ;;  %s1890_s19 = sphi %s1996_s19, %s2333_s19   ;;  %s1886_s18 = sphi %s1994_s18, %s2332_s18  }
  0x14   : > { %p1440_p0 = scmp.ge.s32.totalorder %s1898_s21, 1  ;;  %p55_p1 = scmp.eq.s32.totalorder %s2018_s25, 0 }
  0x15   : > { %p385_p2 = scmp.lt.s32.totalorder %s1898_s21, 3  ;;  %s1900_s27 = smov [#allocation5]  }
  0x16   : > { %s399_s28 = sshll.u32 %s1900_s27, 4  ;;  %s2316_s3 = sld [smem:[#allocation22_spill]]  ;;  %s400_s28 = int_to_ptr.vmem [resolvable:$true] %s399_s28 }
  0x17   : > { %p2023_p3 = pnand %p1440_p0, %p385_p2  ;;  %s2318_s9 = sld [smem:[#allocation24_spill]] }
  0x18   : > { %s1902_s29 = smov 128   ;;  %s1903_s30 = smov 8  }
  0x19   : > { %s397_s24 = sshll.u32 %s2314_s1, 4  ;;  %p1497_p5 = pneg %p2023_p3  ;;  %s398_s24 = int_to_ptr.hbm [resolvable:$true] %s397_s24 }
  0x1a   : > { %s1901_s1 = smov [#allocation8]   ;;  %s2319_s2 = sld [smem:[#allocation21_spill]] }
  0x1b   : > { %p2035_p6 = pnand %p1497_p5, %p55_p1  ;;  %s424_s14 = sshll.u32 %s1901_s1, 4  ;;  %s425_s14 = int_to_ptr.vmem [resolvable:$true] %s424_s14 }
  0x1c   : > { %s422_s16 = sshll.u32 %s2316_s3, 4  ;;  %s1904_s12 = smov [#allocation11]   ;;  %s423_s16 = int_to_ptr.hbm [resolvable:$true] %s422_s16 }
  0x1d   : > { %s462_s27 = sshll.u32 %s2318_s9, 4  ;;  %s464_s10 = sshll.u32 %s1904_s12, 4  ;;  %s463_s27 = int_to_ptr.hbm [resolvable:$true] %s462_s27  ;;  %s465_s10 = int_to_ptr.vmem [resolvable:$true] %s464_s10 }
  0x1e   : > { %1500 = dma.hbm_to_vmem [thread:$0]  (!%p2035_p6), %s398_s24, 64, %s400_s28, [#allocation6]  }
  0x1f   : > { %1506 = dma.hbm_to_vmem [thread:$0]  (!%p2035_p6), %s423_s16, 512, %s425_s14, [#allocation9], %s1902_s29, %s1902_s29, %s1903_s30  }
  0x20   : > { %s408_s15 = sshll.u32 %s2319_s2, 4  ;;  %s1905_s1 = smov [#allocation7]   ;;  %s409_s15 = int_to_ptr.hbm [resolvable:$true] %s408_s15 }
  0x21   : > { %1512 = dma.hbm_to_vmem [thread:$0]  (!%p2035_p6), %s463_s27, 512, %s465_s10, [#allocation12], %s1902_s29, %s1902_s29, %s1903_s30  }
  0x22   : > { %s410_s24 = sshll.u32 %s1905_s1, 4  ;;  %s2320_s5 = sld [smem:[#allocation23_spill]]  ;;  %s411_s24 = int_to_ptr.vmem [resolvable:$true] %s410_s24 }
  0x23   : > { %1503 = dma.hbm_to_vmem [thread:$0]  (!%p2035_p6), %s409_s15, 512, %s411_s24, [#allocation6], %s1902_s29, %s1902_s29, %s1903_s30  }
  0x24   : > { %s479_s10 = sshll.u32 %s2298_s11, 4  ;;  %s1906_s13 = smov [#allocation10]   ;;  %s480_s10 = int_to_ptr.hbm [resolvable:$true] %s479_s10 }
  0x25   : > { %s441_s16 = sshll.u32 %s1906_s13, 4  ;;  %s1907_s23 = smov [#allocation13]   ;;  %s442_s16 = int_to_ptr.vmem [resolvable:$true] %s441_s16 }
  0x26   : > { %s481_s15 = sshll.u32 %s1907_s23, 4  ;;  %s1439_s27 = sadd.s32 4294967294, %s1898_s21   ;;  %s482_s15 = int_to_ptr.vmem [resolvable:$true] %s481_s15 }
  0x27   : > { %1515 = dma.hbm_to_vmem [thread:$0]  (!%p2035_p6), %s480_s10, 512, %s482_s15, [#allocation12], %s1902_s29, %s1902_s29, %s1903_s30  }
  0x28   : > { %s439_s14 = sshll.u32 %s2320_s5, 4  ;;  %s2065_s1 = sadd.s32 1, %s1898_s21   ;;  %s440_s14 = int_to_ptr.hbm [resolvable:$true] %s439_s14 }
  0x29   : > { %1509 = dma.hbm_to_vmem [thread:$0]  (!%p2035_p6), %s440_s14, 512, %s442_s16, [#allocation9], %s1902_s29, %s1902_s29, %s1903_s30  }
  0x2a   : > { %s38_s24 = ssub.s32 %s1898_s21, %s2065_s1  ;;  %s41_s28 = sadd.s32 1, %s1894_s20 }
  0x2b   : > { %p39_p7 = scmp.eq.s32.totalorder %s38_s24, 0  ;;  %p48_p8 = scmp.ne.s32.totalorder %s1894_s20, %s1890_s19 }
  0x2c   : > { %p49_p9 = scmp.eq.s32.totalorder %s1898_s21, 0  ;;  %p54_p10 = scmp.ne.s32.totalorder %s1890_s19, %s1886_s18 }
  0x2d   : > { %s2076_s22 = scalar_select %p39_p7, %s1894_s20, %s41_s28  }
  0x2e   : > { %p2078_p11 = por %p49_p9, %p48_p8  ;;  %p2084_p12 = por %p55_p1, %p54_p10 }
  0x2f   : > { %p372_p13 = scmp.eq.s32.totalorder %s2018_s25, 1  ;;  %p378_p0 = scmp.eq.s32.totalorder %s1439_s27, 1 }
  0x30   : > { %p1530_p2 = scmp.lt.s32.totalorder %s1898_s21, 2  ;;  %s504_s29 = sand.u32 1, %s1894_s20  }
  0x31   : > { %p2091_p5 = por %p372_p13, %p48_p8  ;;  %p2095_p6 = por %p378_p0, %p54_p10 }
  0x32   : > { %s1448_s12 = sshll.u32 %s504_s29, 2  ;;  %s1449_s10 = sshll.u32 %s1898_s21, 2 }
  0x33   : > { %s512_s23 = scalar_lea.hbm %s2287_s0, %s1449_s10  ;;  %s508_s15 = scalar_lea.vmem [#allocation2], %s1448_s12 }
  0x34   : > { %s515_s24 = sshll.u32 %s508_s15, 4  ;;  %s513_s28 = sshll.u32 %s512_s23, 4  ;;  %s516_s24 = int_to_ptr.vmem [resolvable:$true] %s515_s24  ;;  %s514_s28 = int_to_ptr.hbm [resolvable:$true] %s513_s28 }
  0x35   : > { %p2105_p7 = pnand %p1530_p2, %p2078_p11  ;;  %s505_s2 = scalar_lea.sflag [#allocation3], %s504_s29 }
  0x36   : > { %s1790_s5 = sshra.s32 %s514_s28, 4  ;;  %s1797_s13 = scalar_lea.hbm %s2287_s0, 8  ;;  %s1791_s5 = int_to_ptr.hbm [resolvable:$true] %s1790_s5 }
  0x37   : > { %s1792_s9 = scalar_lea.hbm %s1791_s5, 4  ;;  %p1794_p9 = pneg %p2105_p7 }
  0x38   : > { %p1793_p8 = scmp.ne.s32.totalorder %s1791_s5, %s1792_s9  ;;  %p1798_p11 = scmp.lt.s32.totalorder %s1791_s5, %s2287_s0 }
  0x39   : > { %p1799_p0 = scmp.lt.s32.totalorder %s1797_s13, %s1792_s9 }
  0x3a   : > { %p1795_p10 = pnand %p1794_p9, %p1793_p8 }
  0x3b   : > { %p1800_p2 = por %p1799_p0, %p1798_p11 }
  0x3c   : > { %p1796_p13 = pneg %p1795_p10 }
  0x3e   : > { %p1801_p4 = pnand %p1800_p2, %p1796_p13 }
  0x40   : > { %1804 = shalt.err (!%p1801_p4)
}
  0x41   : > { %s1908_s29 = smov 16   ;;  %s1909_s23 = smov 1  }
  0x42   : > { %1519 = dma.hbm_to_vmem [thread:$0]  (!%p2105_p7), %s514_s28, 64, %s516_s24, %s505_s2, %s1908_s29, %s1908_s29, %s1909_s23  }
  0x43   : > { %527 = sbr.rel (%p2023_p3) target bundleno = 1835 (0x72b), region = 80  ;;  %s2122_s15 = sand.u32 (!%p2023_p3), 1, %s1890_s19  }
  0x44   : > { %s1451_s12 = sshll.u32 (!%p2023_p3), %s2122_s15, 2  ;;  %s530_s5 = scalar_lea.sflag (!%p2023_p3), [#allocation3], %s2122_s15 }
  0x45   : > { %s533_s9 = scalar_lea.vmem (!%p2023_p3), [#allocation2], %s1451_s12 }
  0x48   : > { %1865 = dma.done.wait (%p2084_p12), %s530_s5, 64  }
  0x49   : > { %1867 = vsyncadd (%p2084_p12), %s530_s5, 4294967232 }
  0x4a   : > { %1869 = dma.done.wait (%p55_p1), [#allocation6], 576  }
  0x4b   : > { %1871 = vsyncadd (%p55_p1), [#allocation6], 4294966720 }
  0x4c   : > { %1873 = dma.done.wait (%p55_p1), [#allocation9], 1024  }
  0x4d   : > { %1875 = vsyncadd (%p55_p1), [#allocation9], 4294966272 }
  0x4e   : > { %1877 = dma.done.wait (%p55_p1), [#allocation12], 1024  }
  0x4f   : > { %1879 = vsyncadd (%p55_p1), [#allocation12], 4294966272  ;;  %vm618_vm0 = vcmask 1041408   ;;  %v2142_v0 = vld [vmem:[%s533_s9 + $0x1] sm:$0x1]  ;;  %s1910_s2 = smov 96  }
  0x50   : > { %v2144_v1 = vld [vmem:[%s533_s9] sm:$0x1]  ;;  %v2146_v2 = vld [vmem:[%s533_s9 + $0x2] sm:$0x1]  ;;  %v615_v3 = vunpack.c.l.bf16 %v2142_v0  ;;  %v2151_v6 = vld [vmem:[%s533_s9 + $0x3] sm:$0x1] }
  0x51   : > { %v614_v4 = vunpack.c.l.bf16 %v2144_v1  ;;  %v616_v5 = vunpack.c.l.bf16 %v2146_v2  ;;  %v617_v7 = vunpack.c.l.bf16 %v2151_v6  ;;  %s1911_s26 = smov 64   ;;  %s1912_s17 = smov 32   ;;  %v899_v37 = vld [vmem:[#allocation7 + $0x18] sm:$0xff]  ;;  %v898_v38 = vld [vmem:[#allocation7 + $0x10] sm:$0xff]  ;;  %v897_v39 = vld [vmem:[#allocation7 + $0x8] sm:$0xff]  ;;  %vm712_vm1 = vcmask 1041409  }
  0x52   : > { %v626_v8 = vsel %vm618_vm0, %v615_v3, 0.0  ;;  %950 = vmatpush.msra.mxu1 %v899_v37  ;;  %v896_v40 = vld [vmem:[#allocation7] sm:$0xff]  ;;  %vm715_vm2 = vcmask 1042434   ;;  %vm718_vm3 = vcmask 1043459   ;;  %vm730_vm4 = vcmask 261120   ;;  %s2326_s5 = sld [smem:[#allocation25_spill]] }
  0x53   : > { %v619_v9 = vsel %vm618_vm0, %v614_v4, 0.0  ;;  %v633_v10 = vsel %vm618_vm0, %v616_v5, 0.0  ;;  %v627_v11 = vrot.slane %v626_v8, 4  ;;  %v640_v14 = vsel %vm618_vm0, %v617_v7, 0.0  ;;  %s2328_s28 = sld [smem:[#allocation29_spill]]  ;;  %s609_s12 = scalar_lea.vmem [#allocation14], %s2122_s15 }
  0x54   : > { %v620_v12 = vrot.slane %v619_v9, 4  ;;  %v634_v13 = vrot.slane %v633_v10, 4  ;;  %v641_v15 = vrot.slane %v640_v14, 4  ;;  %951 = vmatpush.msra.mxu1 %v898_v38  ;;  %vm732_vm5 = vcmask 523264   ;;  %s2329_s16 = sld [smem:[#allocation27_spill]] }
  0x55   : > { %v628_v16 = vadd.f32 %v627_v11, %v626_v8  ;;  %vm734_vm6 = vcmask 785408   ;;  %s2330_s23 = sld [smem:[#allocation28_spill]] }
  0x56   : > { %v621_v17 = vadd.f32 %v620_v12, %v619_v9  ;;  %v635_v18 = vadd.f32 %v634_v13, %v633_v10  ;;  %v642_v19 = vadd.f32 %v641_v15, %v640_v14  ;;  %952 = vmatpush.msra.mxu1 %v897_v39 }
  0x57   : > { %v629_v20 = vrot.slane %v628_v16, 2 }
  0x58   : > { %v622_v21 = vrot.slane %v621_v17, 2  ;;  %v636_v22 = vrot.slane %v635_v18, 2  ;;  %v643_v23 = vrot.slane %v642_v19, 2  ;;  %953 = vmatpush.msra.mxu1 %v896_v40 }
  0x59   : > { %v630_v24 = vadd.f32 %v629_v20, %v628_v16  ;;  %s1312_s27 = scalar_lea.hbm %s2328_s28, %s2018_s25  ;;  %s1304_s25 = scalar_lea.sflag [#allocation4], %s2122_s15 }
  0x5a   : > { %v623_v25 = vadd.f32 %v622_v21, %v621_v17  ;;  %v637_v28 = vadd.f32 %v636_v22, %v635_v18  ;;  %v644_v29 = vadd.f32 %v643_v23, %v642_v19  ;;  %s1316_s9 = sshll.u32 %s1312_s27, 4  ;;  %s1840_s10 = scalar_lea.hbm %s2328_s28, 2  ;;  %s1317_s9 = int_to_ptr.hbm [resolvable:$true] %s1316_s9 }
  0x5b   : > { %v631_v26 = vrot.slane %v630_v24, 1 }
  0x5c   : > { %v624_v27 = vrot.slane %v623_v25, 1  ;;  %v638_v32 = vrot.slane %v637_v28, 1  ;;  %v645_v33 = vrot.slane %v644_v29, 1 }
  0x5d   : > { %v632_v30 = vadd.f32 %v631_v26, %v630_v24 }
  0x5e   : > { %v625_v31 = vadd.f32 %v624_v27, %v623_v25  ;;  %v639_v34 = vadd.f32 %v638_v32, %v637_v28  ;;  %v646_v35 = vadd.f32 %v645_v33, %v644_v29 }
  0x5f   : > { %657 = vrot.lane.b32.xlu0 %v632_v30, %s1910_s2  ;;  %673 = vrot.lane.b32.xlu2 %v632_v30, %s1911_s26 }
  0x60   : > { %655 = vrot.lane.b32.xlu1 %v625_v31, %s1910_s2 }
  0x67   : > { %659 = vrot.lane.b32.xlu0 %v639_v34, %s1910_s2  ;;  %675 = vrot.lane.b32.xlu2 %v639_v34, %s1911_s26 }
  0x68   : > { %661 = vrot.lane.b32.xlu1 %v646_v35, %s1910_s2 }
  0x6f   : > { %671 = vrot.lane.b32.xlu0 %v625_v31, %s1911_s26  ;;  %689 = vrot.lane.b32.xlu2 %v632_v30, %s1912_s17 }
  0x70   : > { %677 = vrot.lane.b32.xlu1 %v646_v35, %s1911_s26 }
  0x77   : > { %691 = vrot.lane.b32.xlu0 %v639_v34, %s1912_s17  ;;  %693 = vrot.lane.b32.xlu2 %v646_v35, %s1912_s17 }
  0x78   : > { %687 = vrot.lane.b32.xlu1 %v625_v31, %s1912_s17 }
  0xb9   : > { %v674_v36 = vpop.permute.xlu2 %673 }
  0xc1   : > { %v676_v43 = vpop.permute.xlu2 %675 }
  0xc9   : > { %v690_v47 = vpop.permute.xlu2 %689 }
  0xd1   : > { %v658_v41 = vpop.permute.xlu0 %657  ;;  %v694_v55 = vpop.permute.xlu2 %693 }
  0xd2   : > { %v656_v42 = vpop.permute.xlu1 %655  ;;  %v668_v46 = vadd.f32 %v658_v41, %v632_v30 }
  0xd3   : > { %v667_v56 = vadd.f32 %v656_v42, %v625_v31 }
  0xd4   : > { %v684_v48 = vadd.f32 %v674_v36, %v668_v46 }
  0xd6   : > { %v700_v53 = vadd.f32 %v690_v47, %v684_v48 }
  0xd8   : > { %v704_v58 = vmul.f32 0.125, %v700_v53 }
  0xd9   : > { %v660_v44 = vpop.permute.xlu0 %659 }
  0xda   : > { %v662_v45 = vpop.permute.xlu1 %661  ;;  %v669_v54 = vadd.f32 %v660_v44, %v639_v34  ;;  %v711_v10 = vrot.slane %v704_v58, 7 }
  0xdb   : > { %v670_v49 = vadd.f32 %v662_v45, %v646_v35 }
  0xdc   : > { %v685_v60 = vadd.f32 %v676_v43, %v669_v54 }
  0xe1   : > { %v672_v50 = vpop.permute.xlu0 %671 }
  0xe2   : > { %v678_v51 = vpop.permute.xlu1 %677  ;;  %v683_v59 = vadd.f32 %v672_v50, %v667_v56 }
  0xe3   : > { %v686_v52 = vadd.f32 %v678_v51, %v670_v49 }
  0xe5   : > { %v702_v57 = vadd.f32 %v694_v55, %v686_v52 }
  0xe7   : > { %v706_v9 = vmul.f32 0.125, %v702_v57 }
  0xe9   : > { %v692_v61 = vpop.permute.xlu0 %691  ;;  %v717_v15 = vrot.slane %v706_v9, 5  ;;  %v901_v9 = vld [vmem:[#allocation8 + $0x8] sm:$0xff] }
  0xea   : > { %v688_v62 = vpop.permute.xlu1 %687  ;;  %v701_v63 = vadd.f32 %v692_v61, %v685_v60 }
  0xeb   : > { %v699_v8 = vadd.f32 %v688_v62, %v683_v59  ;;  %v903_v62 = vld [vmem:[#allocation8 + $0x18] sm:$0xff] }
  0xec   : > { %v705_v11 = vmul.f32 0.125, %v701_v63  ;;  %v902_v63 = vld [vmem:[#allocation8 + $0x10] sm:$0xff]  ;;  %928 = vmatpush.msra.mxu0 %v903_v62 }
  0xed   : > { %v703_v12 = vmul.f32 0.125, %v699_v8 }
  0xee   : > { %v714_v13 = vrot.slane %v705_v11, 6  ;;  %929 = vmatpush.msra.mxu0 %v902_v63 }
  0xef   : > { %v713_v14 = vsel %vm712_vm1, %v711_v10, %v703_v12  ;;  %v900_v10 = vld [vmem:[#allocation8] sm:$0xff] }
  0xf0   : > { %v716_v16 = vsel %vm715_vm2, %v714_v13, %v713_v14  ;;  %930 = vmatpush.msra.mxu0 %v901_v9 }
  0xf1   : > { %v719_v17 = vsel %vm718_vm3, %v717_v15, %v716_v16 }
  0xf2   : > { %727 = vrot.lane.b32.xlu2 %v719_v17, %s1910_s2  ;;  %724 = vrot.lane.b32.xlu1 %v719_v17, %s1911_s26 }
  0xf3   : > { %721 = vrot.lane.b32.xlu0 %v719_v17, %s1912_s17  ;;  %1459 = vmatmul.msk.f32.vlgmr.msra.gmra.mxu1 %vm730_vm4, %v719_v17 }
  0xf4   : > { %931 = vmatpush.msra.mxu0 %v900_v10 }
 0x14c   : > { %v728_v21 = vpop.permute.xlu2 %727 }
 0x164   : > { %v725_v18 = vpop.permute.xlu1 %724 }
 0x165   : > { %v722_v19 = vpop.permute.xlu0 %721 }
 0x166   : > { %v731_v20 = vsel %vm730_vm4, %v719_v17, %v722_v19 }
 0x167   : > { %v733_v22 = vsel %vm732_vm5, %v731_v20, %v725_v18 }
 0x168   : > { %v735_v23 = vsel %vm734_vm6, %v733_v22, %v728_v21 }
 0x169   : > { %v737_v24 = vrot.slane %v735_v23, 1  ;;  %v738_v25 = vrot.slane %v735_v23, 2  ;;  %v739_v26 = vrot.slane %v735_v23, 3  ;;  %v740_v27 = vperm.slane %v735_v23, 0 }
 0x16b   : > { %v741_v28 = vperm.slane %v737_v24, 0  ;;  %v742_v29 = vperm.slane %v738_v25, 0  ;;  %v743_v30 = vperm.slane %v739_v26, 0  ;;  %v748_v31 = vsub.f32 %v614_v4, %v740_v27 }
 0x16d   : > { %v749_v32 = vsub.f32 %v615_v3, %v741_v28  ;;  %v750_v33 = vsub.f32 %v616_v5, %v742_v29  ;;  %v751_v34 = vsub.f32 %v617_v7, %v743_v30  ;;  %v752_v35 = vmul.f32 %v748_v31, %v748_v31 }
 0x16f   : > { %v753_v36 = vmul.f32 %v749_v32, %v749_v32  ;;  %v754_v37 = vmul.f32 %v750_v33, %v750_v33  ;;  %v755_v38 = vmul.f32 %v751_v34, %v751_v34  ;;  %v756_v39 = vsel %vm618_vm0, %v752_v35, 0.0 }
 0x170   : > { %v757_v40 = vrot.slane %v756_v39, 4 }
 0x171   : > { %v770_v41 = vsel %vm618_vm0, %v754_v37, 0.0  ;;  %v763_v1 = vsel %vm618_vm0, %v753_v36, 0.0  ;;  %v777_v2 = vsel %vm618_vm0, %v755_v38, 0.0 }
 0x172   : > { %v758_v4 = vadd.f32 %v757_v40, %v756_v39  ;;  %v771_v0 = vrot.slane %v770_v41, 4  ;;  %v764_v3 = vrot.slane %v763_v1, 4  ;;  %v778_v45 = vrot.slane %v777_v2, 4 }
 0x174   : > { %v759_v5 = vrot.slane %v758_v4, 2  ;;  %v772_v42 = vadd.f32 %v771_v0, %v770_v41  ;;  %v765_v6 = vadd.f32 %v764_v3, %v763_v1  ;;  %v779_v51 = vadd.f32 %v778_v45, %v777_v2 }
 0x176   : > { %v760_v7 = vadd.f32 %v759_v5, %v758_v4  ;;  %v773_v43 = vrot.slane %v772_v42, 2  ;;  %v766_v44 = vrot.slane %v765_v6, 2  ;;  %v780_v54 = vrot.slane %v779_v51, 2 }
 0x178   : > { %v761_v46 = vrot.slane %v760_v7, 1  ;;  %v774_v47 = vadd.f32 %v773_v43, %v772_v42  ;;  %v767_v50 = vadd.f32 %v766_v44, %v765_v6  ;;  %v781_v56 = vadd.f32 %v780_v54, %v779_v51 }
 0x17a   : > { %v762_v48 = vadd.f32 %v761_v46, %v760_v7  ;;  %v775_v49 = vrot.slane %v774_v47, 1  ;;  %v768_v53 = vrot.slane %v767_v50, 1  ;;  %v782_v57 = vrot.slane %v781_v56, 1 }
 0x17c   : > { %808 = vrot.lane.b32.xlu0 %v762_v48, %s1911_s26  ;;  %792 = vrot.lane.b32.xlu2 %v762_v48, %s1910_s2  ;;  %v776_v52 = vadd.f32 %v775_v49, %v774_v47  ;;  %v769_v55 = vadd.f32 %v768_v53, %v767_v50  ;;  %v783_v58 = vadd.f32 %v782_v57, %v781_v56 }
 0x17e   : > { %796 = vrot.lane.b32.xlu1 %v776_v52, %s1910_s2 }
 0x184   : > { %812 = vrot.lane.b32.xlu2 %v776_v52, %s1911_s26  ;;  %794 = vrot.lane.b32.xlu0 %v769_v55, %s1910_s2 }
 0x186   : > { %810 = vrot.lane.b32.xlu1 %v769_v55, %s1911_s26 }
 0x18c   : > { %826 = vrot.lane.b32.xlu2 %v769_v55, %s1912_s17  ;;  %798 = vrot.lane.b32.xlu0 %v783_v58, %s1910_s2  ;;  %s1834_s2 = sshra.s32 %s1317_s9, 4  ;;  %s1835_s2 = int_to_ptr.hbm [resolvable:$true] %s1834_s2 }
 0x18d   : > { %p1841_p12 = scmp.lt.s32.totalorder %s1835_s2, %s2328_s28 }
 0x18e   : > { %814 = vrot.lane.b32.xlu1 %v783_v58, %s1911_s26  ;;  %s2327_s26 = sld [smem:[#allocation26_spill]] }
 0x194   : > { %830 = vrot.lane.b32.xlu2 %v783_v58, %s1912_s17  ;;  %828 = vrot.lane.b32.xlu0 %v776_v52, %s1912_s17 }
 0x196   : > { %824 = vrot.lane.b32.xlu1 %v762_v48, %s1912_s17 }
 0x1d6   : > { %v793_v59 = vpop.permute.xlu2 %792 }
 0x1d7   : > { %v804_v26 = vadd.f32 %v793_v59, %v762_v48 }
 0x1de   : > { %v813_v60 = vpop.permute.xlu2 %812 }
 0x1e6   : > { %v827_v13 = vpop.permute.xlu2 %826 }
 0x1ee   : > { %v809_v61 = vpop.permute.xlu0 %808  ;;  %v831_v24 = vpop.permute.xlu2 %830 }
 0x1ef   : > { %v820_v31 = vadd.f32 %v809_v61, %v804_v26 }
 0x1f0   : > { %v797_v8 = vpop.permute.xlu1 %796 }
 0x1f1   : > { %v806_v22 = vadd.f32 %v797_v8, %v776_v52 }
 0x1f3   : > { %v822_v28 = vadd.f32 %v813_v60, %v806_v22  ;;  %v1010_v22 = vld [vmem:[#allocation10 + $0x18] sm:$0xff] }
 0x1f4   : > { %1030 = vmatpush.msra.mxu2 %v1010_v22 }
 0x1f6   : > { %v795_v11 = vpop.permute.xlu0 %794 }
 0x1f7   : > { %v805_v12 = vadd.f32 %v795_v11, %v769_v55 }
 0x1f8   : > { %v811_v14 = vpop.permute.xlu1 %810 }
 0x1f9   : > { %v821_v15 = vadd.f32 %v811_v14, %v805_v12 }
 0x1fb   : > { %v837_v16 = vadd.f32 %v827_v13, %v821_v15 }
 0x1fd   : > { %v841_v17 = vmax.f32 %v837_v16, 0.0 }
 0x1fe   : > { %v799_v18 = vpop.permute.xlu0 %798 }
 0x1ff   : > { %v845_v19 = vmul.f32 0.14285715, %v841_v17  ;;  %v807_v20 = vadd.f32 %v799_v18, %v783_v58 }
 0x200   : > { %v815_v21 = vpop.permute.xlu1 %814 }
 0x201   : > { %1588 = vrsqrt.f32 %v845_v19  ;;  %v823_v23 = vadd.f32 %v815_v21, %v807_v20  ;;  %vm867_vm7 = vcmp.eq.f32.partialorder %v845_v19, inf  ;;  %v870_v57 = vand.u32 2147483648, %v845_v19  ;;  %v1584_v21 = vld [vmem:[%s2291_s4] ss:$0 sm:$0xff] }
 0x202   : > { %vm869_vm9 = vcmp.eq.f32.partialorder %v845_v19, 0.0 }
 0x203   : > { %v839_v25 = vadd.f32 %v831_v24, %v823_v23  ;;  %v1009_v23 = vld [vmem:[#allocation10 + $0x10] sm:$0xff]  ;;  %v955_v24 = vpop.f32.mrf.mxu1 }
 0x204   : > { %1031 = vmatpush.msra.mxu2 %v1009_v23 }
 0x205   : > { %v843_v27 = vmax.f32 %v839_v25, 0.0 }
 0x206   : > { %v829_v29 = vpop.permute.xlu0 %828 }
 0x207   : > { %v1589_v30 = vpop.eup %1588  ;;  %v847_v32 = vmul.f32 0.14285715, %v843_v27  ;;  %v838_v33 = vadd.f32 %v829_v29, %v822_v28  ;;  %v1008_v27 = vld [vmem:[#allocation10 + $0x8] sm:$0xff]  ;;  %v1007_v29 = vld [vmem:[#allocation10] sm:$0xff] }
 0x208   : > { %v825_v34 = vpop.permute.xlu1 %824  ;;  %v861_v35 = vmul.f32 %v1589_v30, %v845_v19  ;;  %1032 = vmatpush.msra.mxu2 %v1008_v27 }
 0x209   : > { %1590 = vrsqrt.f32 %v847_v32  ;;  %v842_v36 = vmax.f32 %v838_v33, 0.0  ;;  %v836_v37 = vadd.f32 %v825_v34, %v820_v31  ;;  %vm891_vm8 = vcmp.eq.f32.partialorder %v847_v32, inf }
 0x20a   : > { %v862_v38 = vmul.f32 %v1589_v30, %v861_v35  ;;  %v894_v63 = vand.u32 2147483648, %v847_v32  ;;  %vm893_vm12 = vcmp.eq.f32.partialorder %v847_v32, 0.0  ;;  %1033 = vmatpush.msra.mxu2 %v1007_v29 }
 0x20b   : > { %v846_v39 = vmul.f32 0.14285715, %v842_v36  ;;  %v840_v40 = vmax.f32 %v836_v37, 0.0 }
 0x20c   : > { %v863_v41 = vmul.f32 0.5, %v862_v38 }
 0x20d   : > { %1592 = vrsqrt.f32 %v846_v39  ;;  %v844_v1 = vmul.f32 0.14285715, %v840_v40  ;;  %vm879_vm10 = vcmp.eq.f32.partialorder %v846_v39, inf  ;;  %v882_v62 = vand.u32 2147483648, %v846_v39 }
 0x20e   : > { %v864_v0 = vsub.f32 1.5, %v863_v41  ;;  %vm881_vm11 = vcmp.eq.f32.partialorder %v846_v39, 0.0 }
 0x20f   : > { %v1591_v4 = vpop.eup %1590  ;;  %1594 = vrsqrt.f32 %v844_v1  ;;  %vm855_vm13 = vcmp.eq.f32.partialorder %v844_v1, inf  ;;  %v858_v10 = vand.u32 2147483648, %v844_v1  ;;  %vm857_vm14 = vcmp.eq.f32.partialorder %v844_v1, 0.0 }
 0x210   : > { %v885_v3 = vmul.f32 %v1591_v4, %v847_v32  ;;  %v865_v42 = vmul.f32 %v1589_v30, %v864_v0 }
 0x212   : > { %v886_v2 = vmul.f32 %v1591_v4, %v885_v3  ;;  %v866_v48 = vmul.f32 %v865_v42, %v845_v19 }
 0x213   : > { %v1593_v5 = vpop.eup %1592 }
 0x214   : > { %v873_v6 = vmul.f32 %v1593_v5, %v846_v39  ;;  %v887_v7 = vmul.f32 0.5, %v886_v2  ;;  %v868_v55 = vsel %vm867_vm7, %v845_v19, %v866_v48 }
 0x215   : > { %v1595_v43 = vpop.eup %1594  ;;  %v871_v61 = vsel %vm869_vm9, %v870_v57, %v868_v55 }
 0x216   : > { %v849_v44 = vmul.f32 %v1595_v43, %v844_v1  ;;  %v874_v45 = vmul.f32 %v1593_v5, %v873_v6  ;;  %v888_v46 = vsub.f32 1.5, %v887_v7  ;;  %v908_v14 = vrot.slane %v871_v61, 7  ;;  %v1585_v61 = vld [vmem:[%s2293_s6] ss:$0 sm:$0xff] }
 0x218   : > { %v850_v47 = vmul.f32 %v1595_v43, %v849_v44  ;;  %v875_v49 = vmul.f32 0.5, %v874_v45  ;;  %v889_v50 = vmul.f32 %v1591_v4, %v888_v46 }
 0x21a   : > { %v851_v51 = vmul.f32 0.5, %v850_v47  ;;  %v876_v52 = vsub.f32 1.5, %v875_v49  ;;  %v890_v53 = vmul.f32 %v889_v50, %v847_v32 }
 0x21c   : > { %v852_v54 = vsub.f32 1.5, %v851_v51  ;;  %v877_v56 = vmul.f32 %v1593_v5, %v876_v52  ;;  %v892_v60 = vsel %vm891_vm8, %v847_v32, %v890_v53  ;;  %vm1084_vm8 = vcmask 257024  }
 0x21d   : > { %v895_v12 = vsel %vm893_vm12, %v894_v63, %v892_v60 }
 0x21e   : > { %v853_v58 = vmul.f32 %v1595_v43, %v852_v54  ;;  %v878_v59 = vmul.f32 %v877_v56, %v846_v39  ;;  %v912_v18 = vrot.slane %v895_v12, 5 }
 0x220   : > { %v854_v8 = vmul.f32 %v853_v58, %v844_v1  ;;  %v880_v9 = vsel %vm879_vm10, %v846_v39, %v878_v59 }
 0x221   : > { %v883_v11 = vsel %vm881_vm11, %v882_v62, %v880_v9 }
 0x222   : > { %v856_v13 = vsel %vm855_vm13, %v844_v1, %v854_v8  ;;  %v910_v15 = vrot.slane %v883_v11, 6 }
 0x223   : > { %v859_v16 = vsel %vm857_vm14, %v858_v10, %v856_v13 }
 0x224   : > { %v909_v17 = vsel %vm712_vm1, %v908_v14, %v859_v16 }
 0x225   : > { %v911_v19 = vsel %vm715_vm2, %v910_v15, %v909_v17 }
 0x226   : > { %v913_v20 = vsel %vm718_vm3, %v912_v18, %v911_v19 }
 0x227   : > { %1458 = vmatmul.msk.f32.vlgmr.msra.gmra.mxu0 %vm730_vm4, %v913_v20 }
 0x2a4   : > { %v933_v25 = vpop.f32.mrf.mxu0 }
 0x2a5   : > { %v956_v26 = vadd.f32 %v955_v24, %v933_v25 }
 0x2a7   : > { %v962_v28 = vadd.f32 %v1584_v21, %v956_v26 }
 0x2a9   : > { %v964_v30 = vmul.f32 0.70710677, %v962_v28  ;;  %v963_v58 = vmul.f32 0.5, %v962_v28 }
 0x2ab   : > { %v965_v31 = vmul.f32 %v964_v30, %v964_v30 }
 0x2ad   : > { %v966_v32 = vmin.f32 %v965_v31, 16.0 }
 0x2af   : > { %v967_v33 = vmul.f32 2.1237322e-06, %v966_v32  ;;  %v978_v34 = vmul.f32 3.8918573e-05, %v966_v32 }
 0x2b1   : > { %v968_v35 = vadd.f32 0.00028619796, %v967_v33  ;;  %v979_v36 = vadd.f32 0.001143296, %v978_v34 }
 0x2b3   : > { %v969_v37 = vmul.f32 %v968_v35, %v966_v32  ;;  %v980_v38 = vmul.f32 %v979_v36, %v966_v32 }
 0x2b5   : > { %v981_v39 = vadd.f32 0.014752088, %v980_v38  ;;  %v970_v40 = vadd.f32 0.0036580483, %v969_v37 }
 0x2b7   : > { %v982_v41 = vmul.f32 %v981_v39, %v966_v32  ;;  %v971_v4 = vmul.f32 %v970_v40, %v966_v32 }
 0x2b9   : > { %v983_v1 = vadd.f32 0.112945676, %v982_v41  ;;  %v972_v2 = vadd.f32 0.05243302, %v971_v4 }
 0x2bb   : > { %v984_v0 = vmul.f32 %v983_v1, %v966_v32  ;;  %v973_v6 = vmul.f32 %v972_v2, %v966_v32 }
 0x2bd   : > { %v985_v3 = vadd.f32 0.4994258, %v984_v0  ;;  %v974_v7 = vadd.f32 0.18741608, %v973_v6 }
 0x2bf   : > { %v986_v5 = vmul.f32 %v985_v3, %v966_v32  ;;  %v975_v44 = vmul.f32 %v974_v7, %v966_v32 }
 0x2c1   : > { %v987_v42 = vadd.f32 1.0, %v986_v5  ;;  %v976_v48 = vadd.f32 1.1283791, %v975_v44 }
 0x2c3   : > { %1596 = vrcp.f32 %v987_v42  ;;  %v999_v47 = vand.u32 2147483648, %v987_v42  ;;  %v997_v50 = vand.u32 2147483647, %v987_v42  ;;  %vm993_vm0 = vweird.f32 %v987_v42 }
 0x2c4   : > { %v977_v53 = vmul.f32 %v976_v48, %v964_v30 }
 0x2c5   : > { %v1000_v52 = vor.u32 1.1754944e-38, %v999_v47  ;;  %vm998_vm2 = vcmp.eq.f32.partialorder %v997_v50, 8.507059e+37 }
 0x2c9   : > { %v1597_v43 = vpop.eup %1596 }
 0x2ca   : > { %v989_v45 = vmul.f32 %v1597_v43, %v987_v42  ;;  %vm994_vm15 = vweird.f32 %v1597_v43  ;;  %v1913_v42 = vmov 32.0  }
 0x2cb   : > { %vm995_vm1 = vmor %vm993_vm0, %vm994_vm15 }
 0x2cc   : > { %v990_v46 = vsub.f32 1.0, %v989_v45 }
 0x2ce   : > { %v991_v49 = vmul.f32 %v1597_v43, %v990_v46 }
 0x2d0   : > { %v992_v51 = vadd.f32 %v1597_v43, %v991_v49 }
 0x2d2   : > { %v996_v54 = vsel %vm995_vm1, %v1597_v43, %v992_v51 }
 0x2d3   : > { %v1001_v55 = vsel %vm998_vm2, %v1000_v52, %v996_v54  ;;  %v1134_v52 = vld [vmem:[#allocation11 + $0x18] sm:$0xff]  ;;  %v1132_v54 = vld [vmem:[#allocation11 + $0x8] sm:$0xff] }
 0x2d4   : > { %v1002_v56 = vmul.f32 %v1001_v55, %v977_v53  ;;  %v1133_v53 = vld [vmem:[#allocation11 + $0x10] sm:$0xff]  ;;  %1151 = vmatpush.msra.mxu3 %v1134_v52  ;;  %v1131_v55 = vld [vmem:[#allocation11] sm:$0xff] }
 0x2d6   : > { %v1460_v57 = vclamps-f32 %v1002_v56, 1.0  ;;  %1152 = vmatpush.msra.mxu3 %v1133_v53 }
 0x2d8   : > { %v1005_v59 = vadd.f32 1.0, %v1460_v57  ;;  %1153 = vmatpush.msra.mxu3 %v1132_v54 }
 0x2da   : > { %v1006_v60 = vmul.f32 %v1005_v59, %v963_v58  ;;  %1154 = vmatpush.msra.mxu3 %v1131_v55 }
 0x2dc   : > { %1461 = vmatmul.msk.f32.vlgmr.msra.gmra.mxu2 %vm730_vm4, %v1006_v60 }
 0x35f   : > { %v1035_v62 = vpop.f32.mrf.mxu2 }
 0x360   : > { %v1036_v63 = vadd.f32 %v1585_v61, %v1035_v62 }
 0x362   : > { %v1039_v8 = vmul.f32 0.70710677, %v1036_v63  ;;  %v1038_v0 = vmul.f32 0.5, %v1036_v63 }
 0x364   : > { %v1040_v9 = vmul.f32 %v1039_v8, %v1039_v8 }
 0x366   : > { %v1041_v10 = vmin.f32 %v1040_v9, 16.0  ;;  %v1586_v9 = vld [vmem:[%s2294_s7] ss:$0 sm:$0xff] }
 0x368   : > { %v1042_v11 = vmul.f32 2.1237322e-06, %v1041_v10  ;;  %v1053_v12 = vmul.f32 3.8918573e-05, %v1041_v10 }
 0x36a   : > { %v1043_v13 = vadd.f32 0.00028619796, %v1042_v11  ;;  %v1054_v14 = vadd.f32 0.001143296, %v1053_v12  ;;  %v1587_v12 = vld [vmem:[%s2295_s8] ss:$0 sm:$0xff] }
 0x36c   : > { %v1044_v15 = vmul.f32 %v1043_v13, %v1041_v10  ;;  %v1055_v16 = vmul.f32 %v1054_v14, %v1041_v10  ;;  %v1122_v14 = vld [vmem:[#allocation5] sm:$0xf] }
 0x36e   : > { %v1056_v17 = vadd.f32 0.014752088, %v1055_v16  ;;  %v1045_v18 = vadd.f32 0.0036580483, %v1044_v15 }
 0x370   : > { %v1057_v19 = vmul.f32 %v1056_v17, %v1041_v10  ;;  %v1046_v21 = vmul.f32 %v1045_v18, %v1041_v10 }
 0x372   : > { %v1058_v20 = vadd.f32 0.112945676, %v1057_v19  ;;  %v1047_v24 = vadd.f32 0.05243302, %v1046_v21 }
 0x374   : > { %v1059_v22 = vmul.f32 %v1058_v20, %v1041_v10  ;;  %v1048_v27 = vmul.f32 %v1047_v24, %v1041_v10  ;;  %v1135_v24 = vld [vmem:[%s2326_s5] sm:$0x1]  ;;  %s1314_s5 = sshll.u32 %s609_s12, 4  ;;  %s1315_s5 = int_to_ptr.vmem [resolvable:$true] %s1314_s5 }
 0x376   : > { %v1060_v23 = vadd.f32 0.4994258, %v1059_v22  ;;  %v1049_v28 = vadd.f32 0.18741608, %v1048_v27 }
 0x378   : > { %v1061_v25 = vmul.f32 %v1060_v23, %v1041_v10  ;;  %v1050_v30 = vmul.f32 %v1049_v28, %v1041_v10 }
 0x37a   : > { %v1062_v26 = vadd.f32 1.0, %v1061_v25  ;;  %v1051_v34 = vadd.f32 1.1283791, %v1050_v30 }
 0x37c   : > { %1598 = vrcp.f32 %v1062_v26  ;;  %v1074_v33 = vand.u32 2147483648, %v1062_v26  ;;  %v1072_v36 = vand.u32 2147483647, %v1062_v26  ;;  %vm1068_vm5 = vweird.f32 %v1062_v26 }
 0x37d   : > { %v1052_v39 = vmul.f32 %v1051_v34, %v1039_v8  ;;  %1600 = vrcp.f32 %v1913_v42 }
 0x37e   : > { %v1075_v38 = vor.u32 1.1754944e-38, %v1074_v33  ;;  %vm1073_vm7 = vcmp.eq.f32.partialorder %v1072_v36, 8.507059e+37 }
 0x382   : > { %v1599_v29 = vpop.eup %1598 }
 0x383   : > { %v1064_v31 = vmul.f32 %v1599_v29, %v1062_v26  ;;  %vm1069_vm3 = vweird.f32 %v1599_v29  ;;  %v1601_v6 = vpop.eup %1600 }
 0x384   : > { %vm1070_vm6 = vmor %vm1068_vm5, %vm1069_vm3  ;;  %v1089_v7 = vmul.f32 32.0, %v1601_v6  ;;  %vm1093_vm9 = vweird.f32 %v1601_v6  ;;  %vm1277_vm5 = vcmask 253952  }
 0x385   : > { %v1065_v32 = vsub.f32 1.0, %v1064_v31 }
 0x386   : > { %v1090_v43 = vsub.f32 1.0, %v1089_v7 }
 0x387   : > { %v1066_v35 = vmul.f32 %v1599_v29, %v1065_v32 }
 0x388   : > { %v1091_v44 = vmul.f32 %v1601_v6, %v1090_v43 }
 0x389   : > { %v1067_v37 = vadd.f32 %v1599_v29, %v1066_v35 }
 0x38a   : > { %v1092_v45 = vadd.f32 %v1601_v6, %v1091_v44 }
 0x38b   : > { %v1071_v40 = vsel %vm1070_vm6, %v1599_v29, %v1067_v37  ;;  %v1206_v37 = vld [vmem:[#allocation13 + $0x18] sm:$0xff] }
 0x38c   : > { %v1076_v41 = vsel %vm1073_vm7, %v1075_v38, %v1071_v40  ;;  %v2222_v46 = vsel %vm1093_vm9, %v1601_v6, %v1092_v45  ;;  %1223 = vmatpush.msrb.mxu0 %v1206_v37  ;;  %v1205_v40 = vld [vmem:[#allocation13 + $0x10] sm:$0xff] }
 0x38d   : > { %v1077_v1 = vmul.f32 %v1076_v41, %v1052_v39 }
 0x38e   : > { %1224 = vmatpush.msrb.mxu0 %v1205_v40 }
 0x38f   : > { %v1462_v4 = vclamps-f32 %v1077_v1, 1.0  ;;  %v1204_v1 = vld [vmem:[#allocation13 + $0x8] sm:$0xff] }
 0x390   : > { %1225 = vmatpush.msrb.mxu0 %v1204_v1 }
 0x391   : > { %v1080_v3 = vadd.f32 1.0, %v1462_v4 }
 0x393   : > { %v1081_v2 = vmul.f32 %v1080_v3, %v1038_v0  ;;  %v1203_v0 = vld [vmem:[#allocation13] sm:$0xff] }
 0x394   : > { %1226 = vmatpush.msrb.mxu0 %v1203_v0 }
 0x395   : > { %v1085_v5 = vsel %vm1084_vm8, %v1081_v2, 0.0 }
 0x396   : > { %1086 = vadd.xlane.f32.xlu0 %v1085_v5 }
 0x409   : > { %v1087_v47 = vpop.xlane.xlu0 %1086 }
 0x40a   : > { %v1095_v48 = vmul.f32 %v2222_v46, %v1087_v47 }
 0x40c   : > { %v1096_v49 = vsub.f32 %v1081_v2, %v1095_v48 }
 0x40e   : > { %v1097_v50 = vmul.f32 %v1096_v49, %v1096_v49 }
 0x410   : > { %v1098_v51 = vsel %vm1084_vm8, %v1097_v50, 0.0 }
 0x411   : > { %1099 = vadd.xlane.f32.xlu1 %v1098_v51 }
 0x484   : > { %v1100_v56 = vpop.xlane.xlu1 %1099 }
 0x485   : > { %v1101_v57 = vmul.f32 %v1100_v56, %v2222_v46 }
 0x487   : > { %v1102_v58 = vadd.f32 1e-05, %v1101_v57 }
 0x489   : > { %1602 = vrsqrt.f32 %v1102_v58  ;;  %vm1109_vm11 = vweird.f32 %v1102_v58 }
 0x48f   : > { %v1603_v59 = vpop.eup %1602 }
 0x490   : > { %v1104_v60 = vmul.f32 %v1603_v59, %v1102_v58  ;;  %vm1110_vm10 = vweird.f32 %v1603_v59 }
 0x491   : > { %vm1111_vm12 = vmor %vm1109_vm11, %vm1110_vm10 }
 0x492   : > { %v1105_v61 = vmul.f32 %v1603_v59, %v1104_v60 }
 0x494   : > { %v1106_v62 = vmul.f32 0.5, %v1105_v61 }
 0x496   : > { %v1107_v63 = vsub.f32 1.5, %v1106_v62 }
 0x498   : > { %v1108_v8 = vmul.f32 %v1603_v59, %v1107_v63  ;;  %v1207_v63 = vld [vmem:[%s2327_s26] sm:$0x1]  ;;  %s1836_s26 = scalar_lea.hbm %s1835_s2, 1 }
 0x499   : > { %p1837_p1 = scmp.ne.s32.totalorder %s1835_s2, %s1836_s26  ;;  %p1842_p7 = scmp.lt.s32.totalorder %s1840_s10, %s1836_s26 }
 0x49a   : > { %v1112_v10 = vsel %vm1111_vm12, %v1603_v59, %v1108_v8 }
 0x49b   : > { %v1113_v11 = vmul.f32 %v1112_v10, %v1096_v49  ;;  %p1838_p3 = pnand %p1837_p1, %p2091_p5  ;;  %p1843_p8 = por %p1842_p7, %p1841_p12 }
 0x49d   : > { %v1117_v13 = vmul.f32 %v1586_v9, %v1113_v11  ;;  %p1839_p4 = pneg %p1838_p3 }
 0x49f   : > { %v1121_v15 = vadd.f32 %v1587_v12, %v1117_v13  ;;  %p1844_p9 = pnand %p1843_p8, %p1839_p4 }
 0x4a1   : > { %v1123_v16 = vmul.f32 %v1122_v14, %v1121_v15 }
 0x4a3   : > { %v1124_v17 = vsel %vm1084_vm8, %v1123_v16, 0.0 }
 0x4a4   : > { %v1125_v18 = vrot.slane %v1124_v17, 4 }
 0x4a6   : > { %v1126_v19 = vadd.f32 %v1125_v18, %v1124_v17 }
 0x4a8   : > { %v1127_v20 = vrot.slane %v1126_v19, 2 }
 0x4aa   : > { %v1128_v21 = vadd.f32 %v1127_v20, %v1126_v19 }
 0x4ac   : > { %v1129_v22 = vrot.slane %v1128_v21, 1 }
 0x4ae   : > { %v1130_v23 = vadd.f32 %v1129_v22, %v1128_v21 }
 0x4b0   : > { %1463 = vmatmul.msk.f32.vlgmr.msra.gmra.mxu3 %vm730_vm4, %v1130_v23 }
 0x533   : > { %v1156_v25 = vpop.f32.mrf.mxu3 }
 0x534   : > { %v1157_v26 = vadd.f32 %v1156_v25, %v1135_v24 }
 0x536   : > { %v1160_v27 = vmul.f32 0.70710677, %v1157_v26  ;;  %v1159_v60 = vmul.f32 0.5, %v1157_v26 }
 0x538   : > { %v1161_v28 = vmul.f32 %v1160_v27, %v1160_v27 }
 0x53a   : > { %v1162_v29 = vmin.f32 %v1161_v28, 16.0 }
 0x53c   : > { %v1163_v30 = vmul.f32 2.1237322e-06, %v1162_v29  ;;  %v1174_v31 = vmul.f32 3.8918573e-05, %v1162_v29 }
 0x53e   : > { %v1164_v32 = vadd.f32 0.00028619796, %v1163_v30  ;;  %v1175_v33 = vadd.f32 0.001143296, %v1174_v31 }
 0x540   : > { %v1165_v34 = vmul.f32 %v1164_v32, %v1162_v29  ;;  %v1176_v35 = vmul.f32 %v1175_v33, %v1162_v29 }
 0x542   : > { %v1177_v36 = vadd.f32 0.014752088, %v1176_v35  ;;  %v1166_v38 = vadd.f32 0.0036580483, %v1165_v34 }
 0x544   : > { %v1178_v39 = vmul.f32 %v1177_v36, %v1162_v29  ;;  %v1167_v4 = vmul.f32 %v1166_v38, %v1162_v29 }
 0x546   : > { %v1179_v41 = vadd.f32 0.112945676, %v1178_v39  ;;  %v1168_v5 = vadd.f32 0.05243302, %v1167_v4 }
 0x548   : > { %v1180_v3 = vmul.f32 %v1179_v41, %v1162_v29  ;;  %v1169_v7 = vmul.f32 %v1168_v5, %v1162_v29 }
 0x54a   : > { %v1181_v2 = vadd.f32 0.4994258, %v1180_v3  ;;  %v1170_v43 = vadd.f32 0.18741608, %v1169_v7 }
 0x54c   : > { %v1182_v42 = vmul.f32 %v1181_v2, %v1162_v29  ;;  %v1171_v45 = vmul.f32 %v1170_v43, %v1162_v29 }
 0x54e   : > { %v1183_v6 = vadd.f32 1.0, %v1182_v42  ;;  %v1172_v50 = vadd.f32 1.1283791, %v1171_v45 }
 0x550   : > { %1604 = vrcp.f32 %v1183_v6  ;;  %v1195_v49 = vand.u32 2147483648, %v1183_v6  ;;  %v1193_v52 = vand.u32 2147483647, %v1183_v6  ;;  %vm1189_vm14 = vweird.f32 %v1183_v6 }
 0x551   : > { %v1173_v55 = vmul.f32 %v1172_v50, %v1160_v27 }
 0x552   : > { %v1196_v54 = vor.u32 1.1754944e-38, %v1195_v49  ;;  %vm1194_vm0 = vcmp.eq.f32.partialorder %v1193_v52, 8.507059e+37 }
 0x556   : > { %v1605_v44 = vpop.eup %1604 }
 0x557   : > { %v1185_v47 = vmul.f32 %v1605_v44, %v1183_v6  ;;  %vm1190_vm13 = vweird.f32 %v1605_v44 }
 0x558   : > { %vm1191_vm15 = vmor %vm1189_vm14, %vm1190_vm13 }
 0x559   : > { %v1186_v48 = vsub.f32 1.0, %v1185_v47 }
 0x55b   : > { %v1187_v51 = vmul.f32 %v1605_v44, %v1186_v48 }
 0x55d   : > { %v1188_v53 = vadd.f32 %v1605_v44, %v1187_v51 }
 0x55f   : > { %v1192_v56 = vsel %vm1191_vm15, %v1605_v44, %v1188_v53 }
 0x560   : > { %v1197_v57 = vsel %vm1194_vm0, %v1196_v54, %v1192_v56 }
 0x561   : > { %v1198_v58 = vmul.f32 %v1197_v57, %v1173_v55 }
 0x563   : > { %v1464_v59 = vclamps-f32 %v1198_v58, 1.0 }
 0x565   : > { %v1201_v61 = vadd.f32 1.0, %v1464_v59  ;;  %v1276_v59 = vld [vmem:[%s2330_s23] sm:$0x1] }
 0x567   : > { %v1202_v62 = vmul.f32 %v1201_v61, %v1159_v60 }
 0x569   : > { %1465 = vmatmul.msk.f32.vlgmr.msrb.gmra.mxu0 %vm730_vm4, %v1202_v62 }
 0x5e6   : > { %v1228_v8 = vpop.f32.mrf.mxu0 }
 0x5e7   : > { %v1229_v9 = vadd.f32 %v1228_v8, %v1207_v63 }
 0x5e9   : > { %v1232_v10 = vmul.f32 0.70710677, %v1229_v9  ;;  %v1231_v2 = vmul.f32 0.5, %v1229_v9 }
 0x5eb   : > { %v1233_v11 = vmul.f32 %v1232_v10, %v1232_v10 }
 0x5ed   : > { %v1234_v12 = vmin.f32 %v1233_v11, 16.0 }
 0x5ef   : > { %v1235_v13 = vmul.f32 2.1237322e-06, %v1234_v12  ;;  %v1246_v14 = vmul.f32 3.8918573e-05, %v1234_v12 }
 0x5f1   : > { %v1236_v15 = vadd.f32 0.00028619796, %v1235_v13  ;;  %v1247_v16 = vadd.f32 0.001143296, %v1246_v14 }
 0x5f3   : > { %v1237_v17 = vmul.f32 %v1236_v15, %v1234_v12  ;;  %v1248_v18 = vmul.f32 %v1247_v16, %v1234_v12 }
 0x5f5   : > { %v1249_v19 = vadd.f32 0.014752088, %v1248_v18  ;;  %v1238_v20 = vadd.f32 0.0036580483, %v1237_v17 }
 0x5f7   : > { %v1250_v21 = vmul.f32 %v1249_v19, %v1234_v12  ;;  %v1239_v23 = vmul.f32 %v1238_v20, %v1234_v12 }
 0x5f9   : > { %v1251_v22 = vadd.f32 0.112945676, %v1250_v21  ;;  %v1240_v26 = vadd.f32 0.05243302, %v1239_v23 }
 0x5fb   : > { %v1252_v24 = vmul.f32 %v1251_v22, %v1234_v12  ;;  %v1241_v29 = vmul.f32 %v1240_v26, %v1234_v12 }
 0x5fd   : > { %v1253_v25 = vadd.f32 0.4994258, %v1252_v24  ;;  %v1242_v30 = vadd.f32 0.18741608, %v1241_v29 }
 0x5ff   : > { %v1254_v27 = vmul.f32 %v1253_v25, %v1234_v12  ;;  %v1243_v32 = vmul.f32 %v1242_v30, %v1234_v12 }
 0x601   : > { %v1255_v28 = vadd.f32 1.0, %v1254_v27  ;;  %v1244_v36 = vadd.f32 1.1283791, %v1243_v32 }
 0x603   : > { %1606 = vrcp.f32 %v1255_v28  ;;  %v1267_v35 = vand.u32 2147483648, %v1255_v28  ;;  %v1265_v38 = vand.u32 2147483647, %v1255_v28  ;;  %vm1261_vm1 = vweird.f32 %v1255_v28 }
 0x604   : > { %v1245_v41 = vmul.f32 %v1244_v36, %v1232_v10 }
 0x605   : > { %v1268_v40 = vor.u32 1.1754944e-38, %v1267_v35  ;;  %vm1266_vm3 = vcmp.eq.f32.partialorder %v1265_v38, 8.507059e+37 }
 0x609   : > { %v1607_v31 = vpop.eup %1606 }
 0x60a   : > { %v1257_v33 = vmul.f32 %v1607_v31, %v1255_v28  ;;  %vm1262_vm4 = vweird.f32 %v1607_v31 }
 0x60b   : > { %vm1263_vm2 = vmor %vm1261_vm1, %vm1262_vm4 }
 0x60c   : > { %v1258_v34 = vsub.f32 1.0, %v1257_v33 }
 0x60e   : > { %v1259_v37 = vmul.f32 %v1607_v31, %v1258_v34 }
 0x610   : > { %v1260_v39 = vadd.f32 %v1607_v31, %v1259_v37 }
 0x612   : > { %v1264_v1 = vsel %vm1263_vm2, %v1607_v31, %v1260_v39 }
 0x613   : > { %v1269_v4 = vsel %vm1266_vm3, %v1268_v40, %v1264_v1 }
 0x614   : > { %v1270_v0 = vmul.f32 %v1269_v4, %v1245_v41 }
 0x616   : > { %v1466_v3 = vclamps-f32 %v1270_v0, 1.0 }
 0x618   : > { %v1273_v5 = vadd.f32 1.0, %v1466_v3 }
 0x61a   : > { %v1274_v42 = vmul.f32 %v1273_v5, %v1231_v2 }
 0x61c   : > { %v1278_v6 = vsel %vm1277_vm5, %v1274_v42, 0.0 }
 0x61d   : > { %1279 = vadd.xlane.f32.xlu2 %v1278_v6 }
 0x690   : > { %v1280_v7 = vpop.xlane.xlu2 %1279 }
 0x691   : > { %v1281_v43 = vmul.f32 %v1280_v7, %v2222_v46 }
 0x693   : > { %v1282_v44 = vsub.f32 %v1274_v42, %v1281_v43 }
 0x695   : > { %v1283_v45 = vmul.f32 %v1282_v44, %v1282_v44 }
 0x697   : > { %v1284_v47 = vsel %vm1277_vm5, %v1283_v45, 0.0 }
 0x698   : > { %1285 = vadd.xlane.f32.xlu2 %v1284_v47 }
 0x70b   : > { %v1286_v48 = vpop.xlane.xlu2 %1285 }
 0x70c   : > { %v1287_v49 = vmul.f32 %v1286_v48, %v2222_v46  ;;  %v1275_v46 = vld [vmem:[%s2329_s16] sm:$0x1] }
 0x70e   : > { %v1288_v50 = vadd.f32 1e-05, %v1287_v49 }
 0x710   : > { %1608 = vrsqrt.f32 %v1288_v50  ;;  %vm1295_vm7 = vweird.f32 %v1288_v50 }
 0x716   : > { %v1609_v51 = vpop.eup %1608 }
 0x717   : > { %v1290_v52 = vmul.f32 %v1609_v51, %v1288_v50  ;;  %vm1296_vm6 = vweird.f32 %v1609_v51 }
 0x718   : > { %vm1297_vm8 = vmor %vm1295_vm7, %vm1296_vm6 }
 0x719   : > { %v1291_v53 = vmul.f32 %v1609_v51, %v1290_v52 }
 0x71b   : > { %v1292_v54 = vmul.f32 0.5, %v1291_v53 }
 0x71d   : > { %v1293_v55 = vsub.f32 1.5, %v1292_v54 }
 0x71f   : > { %v1294_v56 = vmul.f32 %v1609_v51, %v1293_v55 }
 0x721   : > { %v1298_v57 = vsel %vm1297_vm8, %v1609_v51, %v1294_v56 }
 0x722   : > { %v1299_v58 = vmul.f32 %v1298_v57, %v1282_v44 }
 0x724   : > { %v1300_v60 = vmul.f32 %v1299_v58, %v1275_v46 }
 0x726   : > { %v1301_v61 = vadd.f32 %v1300_v60, %v1276_v59 }
 0x728   : > { %1302 = vst.msk [vmem:[%s609_s12] sm:$0x1] %vm1277_vm5, %v1301_v61 }
 0x729   : > { %1847 = shalt.err (!%p1844_p9)
}
 0x72a   : > { %1495 = dma.vmem_to_hbm [thread:$0]  (%p2091_p5), %s1315_s5, 16, %s1317_s9, %s1304_s25  }
 0x72b PF: > { %s1328_s15 = sand.u32 1, %s1886_s18   ;;  %p2331_p10 = scmp.ge.s32.totalorder %s1898_s21, 2 }
 0x72c   : > { %s1329_s16 = scalar_lea.sflag [#allocation4], %s1328_s15 }
 0x72d   : > { %p1521_p13 = pnand %p2331_p10, %p2095_p6 }
 0x72f   : > { %p1522_p11 = pneg %p1521_p13 }
 0x731   : > { %1881 = dma.done.wait (%p1522_p11), %s1329_s16, 16  }
 0x732   : > { %1883 = vsyncadd (%p1522_p11), %s1329_s16, 4294967280  ;;  %p31_p0 = scmp.ge.s32.totalorder %s2065_s1, 4   ;;  %s2332_s18 = smov %s1890_s19 }
 0x733   : > { %s2333_s19 = smov %s1894_s20  ;;  %s2334_s20 = smov %s2076_s22 }
 0x734   : > { %s2335_s21 = smov %s2065_s1  ;;  %33 = sbr.rel (!%p31_p0) target bundleno = 19 (0x13), region = 149 }
 0x739   :  { %1334 = vsyncpa [#allocation3], 1 }
 0x73a   :  { %1336 = vsyncpa [#allocation3 + $0x1], 1 }
 0x73b   :  { %1337 = vsyncpa [#allocation6], 1 }
 0x73c   :  { %1338 = vsyncpa [#allocation9], 1 }
 0x73d   :  { %1339 = vsyncpa [#allocation12], 1 }
 0x73e   :  { %1340 = vsyncpa [#allocation4], 1 }
 0x73f   :  { %1342 = vsyncpa [#allocation4 + $0x1], 1 }

</bundles_post_ra>
